<compile_context>
chip_gen: v7x
topology: tpu7x:2x2x1
jax: 0.10.0
libtpu: 0.0.40
codegen_flags: <defaults>
</compile_context>

<pallas_src>
import functools

import jax
import jax.numpy as jnp
from jax.experimental import pallas as pl
from jax.experimental.pallas import tpu as pltpu


# ------------------------------ fused kernel ------------------------------ #
def _ricci_fused_kernel(
    x_ref,                      # [Bt, m]           bf16  points tile
    w1m_ref, b1m_ref,           # [m, H] bf16 / [1, H] f32        metric W1, b1
    w2m_ref, b2m_ref,           # [H, m*m] bf16 / [1, m*m] f32    metric W2, b2
    w1cp_ref, b1c_ref,          # [m, H] bf16 / [1, H] f32        christoffel W1 (points rows), b1
    w1rp_ref, b1r_ref,          # [m, 2H] bf16 / [1, 2H] f32      ricci W1 (points rows), b1
    a_ref,                      # [m, m*m, m*m*H]   f32  metric -> christoffel-hidden embed (per k)
    c_ref,                      # [m*m*H, m*m]      f32  christoffel head (block-diag w2c)
    ag_ref,                     # [m*m, m*m*2H]     f32  g_ij   -> ricci-hidden embed
    ar_ref,                     # [m, m*m, m*m*2H]  f32  chris_k -> ricci-hidden embed (per k)
    r_ref,                      # [m*m*2H, m*m]     f32  ricci head (block-diag w2r)
    b2c_ref, b2r_ref,           # [1, 1] f32 scalars b2c / b2r
    o_ref,                      # [Bt, m*m] f32 output (ricci, pair index p = i*m + j)
    *, m,
):
    f32 = jnp.float32
    mm = m * m
    x = x_ref[...]                                               # bf16 [Bt, m]

    # ---- metric network:  g = relu(x @ W1m + b1m) @ W2m + b2m -------------
    h_m = jnp.maximum(
        jnp.dot(x, w1m_ref[...], preferred_element_type=f32) + b1m_ref[...],
        0.0)
    g = jnp.dot(h_m.astype(w2m_ref.dtype), w2m_ref[...],
                preferred_element_type=f32) + b2m_ref[...]       # [Bt, mm] f32

    # ---- "points" part of the christoffel / ricci first layers ------------
    # (computed once per batch row, then tiled along lanes: lane = p*H + h)
    p_c = jnp.dot(x, w1cp_ref[...], preferred_element_type=f32) + b1c_ref[...]   # [Bt, H]
    p_r = jnp.dot(x, w1rp_ref[...], preferred_element_type=f32) + b1r_ref[...]   # [Bt, 2H]
    p_c_t = jnp.concatenate([p_c] * mm, axis=-1)                 # [Bt, mm*H]
    p_r_t = jnp.concatenate([p_r] * mm, axis=-1)                 # [Bt, mm*2H]

    b2c = b2c_ref[...]                                           # (1, 1)
    b2r = b2r_ref[...]                                           # (1, 1)

    # ---- ricci first-layer pre-activation, accumulated over k --------------
    # acc[b, p*2H + h2] = pts@W1r + b1r + g_ij * w_g   (christoffel terms added below)
    acc = p_r_t + jnp.dot(g, ag_ref[...], preferred_element_type=f32)   # [Bt, mm*2H]

    for k in range(m):                       # static unroll, m is small
        # christoffel hidden: tanh(pts@W1c + g_ij*w_ij + g_jk*w_jk + g_ki*w_ki + b1c)
        pre = p_c_t + jnp.dot(g, a_ref[k], preferred_element_type=f32)  # [Bt, mm*H]
        t_k = jnp.tanh(pre)
        # christoffel[:, i, j, k]  (head = block-diagonal w2c)            [Bt, mm]
        chris_k = jnp.dot(t_k, c_ref[...], preferred_element_type=f32) + b2c
        # its contribution to the ricci first layer (w1r rows m+1+k)
        acc = acc + jnp.dot(chris_k, ar_ref[k], preferred_element_type=f32)

    # ---- ricci head --------------------------------------------------------
    h_r = jnp.maximum(acc, 0.0)                                           # [Bt, mm*2H]
    ricci = jnp.dot(h_r, r_ref[...], preferred_element_type=f32) + b2r    # [Bt, mm]
    o_ref[...] = ricci.astype(o_ref.dtype)


# ------------------------- host-side constant build ------------------------ #
def _ricci_embed_constants(m, w1c, w2c, w1r, w2r):
    """Block-structured matrices that implement the per-(i,j,k) scalar terms."""
    mm = m * m
    p = jnp.arange(mm)
    i_idx, j_idx = p // m, p % m
    a = jnp.arange(mm)[:, None]
    eye = (a == p[None, :]).astype(jnp.float32)                  # [mm, mm]

    def embed(sel, wrow):
        # out[a, p*Hd + h] = sel[a, p] * wrow[h]
        return (sel[:, :, None] * wrow[None, None, :]).reshape(mm, -1)

    a_list, ar_list = [], []
    for k in range(m):
        sel_jk = (a == (j_idx * m + k)[None, :]).astype(jnp.float32)   # a == j*m+k
        sel_ki = (a == (k * m + i_idx)[None, :]).astype(jnp.float32)   # a == k*m+i
        a_list.append(embed(eye, w1c[m]) + embed(sel_jk, w1c[m + 1])
                      + embed(sel_ki, w1c[m + 2]))
        ar_list.append(embed(eye, w1r[m + 1 + k]))
    A = jnp.stack(a_list, axis=0)           # [m, mm, mm*H]
    Ar = jnp.stack(ar_list, axis=0)         # [m, mm, mm*2H]
    C = embed(eye, w2c[:, 0]).T             # [mm*H, mm]
    Ag = embed(eye, w1r[m])                 # [mm, mm*2H]
    R = embed(eye, w2r[:, 0]).T             # [mm*2H, mm]
    return A, C, Ag, Ar, R


# ------------------------------- entry point ------------------------------- #
def ricci_tensor_network(points, params, manifold_dim, *, block_rows=256,
                         matmul_dtype=jnp.bfloat16):
    """Forward pass of RicciTensorNetwork. points: [B, m] -> ricci: [B, m, m]."""
    B, m = points.shape
    assert m == manifold_dim
    mm = m * m

    w1m, b1m, w2m, b2m = params["metric"]
    w1c, b1c, w2c, b2c = params["christoffel"]
    w1r, b1r, w2r, b2r = params["ricci"]
    H = w1m.shape[1]
    H2 = w1r.shape[1]

    # host-side repack of the forward-implied weights
    A, C, Ag, Ar, R = _ricci_embed_constants(m, w1c, w2c, w1r, w2r)
    x = points.astype(matmul_dtype)
    w1m_c = w1m.astype(matmul_dtype)
    w2m_c = w2m.astype(matmul_dtype)
    w1cp_c = w1c[:m].astype(matmul_dtype)
    w1rp_c = w1r[:m].astype(matmul_dtype)
    b1m_r = b1m.reshape(1, H).astype(jnp.float32)
    b2m_r = b2m.reshape(1, mm).astype(jnp.float32)
    b1c_r = b1c.reshape(1, H).astype(jnp.float32)
    b1r_r = b1r.reshape(1, H2).astype(jnp.float32)
    b2c_r = b2c.reshape(1, 1).astype(jnp.float32)
    b2r_r = b2r.reshape(1, 1).astype(jnp.float32)

    # batch tiling: one fused kernel invocation per Bt-row tile
    Bt = B if B <= block_rows else block_rows        # block_rows is a multiple of 8
    Bpad = ((B + Bt - 1) // Bt) * Bt
    if Bpad != B:
        x = jnp.pad(x, ((0, Bpad - B), (0, 0)))

    const2 = lambda b: (0, 0)          # noqa: E731  (weights stay VMEM-resident)
    const3 = lambda b: (0, 0, 0)       # noqa: E731

    out = pl.pallas_call(
        functools.partial(_ricci_fused_kernel, m=m),
        out_shape=jax.ShapeDtypeStruct((Bpad, mm), jnp.float32),
        grid=(Bpad // Bt,),
        in_specs=[
            pl.BlockSpec((Bt, m), lambda b: (b, 0)),
            pl.BlockSpec((m, H), const2),
            pl.BlockSpec((1, H), const2),
            pl.BlockSpec((H, mm), const2),
            pl.BlockSpec((1, mm), const2),
            pl.BlockSpec((m, H), const2),
            pl.BlockSpec((1, H), const2),
            pl.BlockSpec((m, H2), const2),
            pl.BlockSpec((1, H2), const2),
            pl.BlockSpec((m, mm, mm * H), const3),
            pl.BlockSpec((mm * H, mm), const2),
            pl.BlockSpec((mm, mm * H2), const2),
            pl.BlockSpec((m, mm, mm * H2), const3),
            pl.BlockSpec((mm * H2, mm), const2),
            pl.BlockSpec((1, 1), const2),
            pl.BlockSpec((1, 1), const2),
        ],
        out_specs=pl.BlockSpec((Bt, mm), lambda b: (b, 0)),
        compiler_params=pltpu.CompilerParams(
            dimension_semantics=("parallel",),
            vmem_limit_bytes=32 * 1024 * 1024,
        ),
    )(x, w1m_c, b1m_r, w2m_c, b2m_r,
      w1cp_c, b1c_r, w1rp_c, b1r_r,
      A, C, Ag, Ar, R, b2c_r, b2r_r)

    return out[:B].reshape(B, m, m)


# ----------------------------- pure-JAX reference -------------------------- #
def ricci_reference(points, params, m):
    """f32 reference mirroring the PyTorch forward loops (for validation)."""
    w1m, b1m, w2m, b2m = params["metric"]
    w1c, b1c, w2c, b2c = params["christoffel"]
    w1r, b1r, w2r, b2r = params["ricci"]
    B = points.shape[0]
    metric = (jnp.maximum(points @ w1m + b1m, 0.0) @ w2m + b2m).reshape(B, m, m)
    chris = jnp.zeros((B, m, m, m), jnp.float32)
    for i in range(m):
        for j in range(m):
            for k in range(m):
                xin = jnp.concatenate(
                    [points, metric[:, i, j, None], metric[:, j, k, None],
                     metric[:, k, i, None]], axis=1)
                y = jnp.tanh(xin @ w1c + b1c) @ w2c + b2c
                chris = chris.at[:, i, j, k].set(y[:, 0])
    ricci = jnp.zeros((B, m, m), jnp.float32)
    for i in range(m):
        for j in range(m):
            xin = jnp.concatenate(
                [points, metric[:, i, j, None], chris[:, i, j, :]], axis=1)
            y = jnp.maximum(xin @ w1r + b1r, 0.0) @ w2r + b2r
            ricci = ricci.at[:, i, j].set(y[:, 0])
    return ricci


# -------------------------------- model glue ------------------------------- #
def init_linear(key, fan_in, fan_out):
    """Deterministic nn.Linear-style init: U(-1/sqrt(fan_in), 1/sqrt(fan_in))."""
    kw, kb = jax.random.split(key)
    bound = 1.0 / (fan_in ** 0.5)
    w = jax.random.uniform(kw, (fan_in, fan_out), jnp.float32, -bound, bound)
    b = jax.random.uniform(kb, (fan_out,), jnp.float32, -bound, bound)
    return (w, b)


if __name__ == "__main__":
    B, m, H = 8, 4, 32   # batch, manifold_dim, hidden_dim (small demo sizes)

    key = jax.random.PRNGKey(0)
    k_pts, k1, k2, k3, k4, k5, k6 = jax.random.split(key, 7)
    points = jax.random.normal(k_pts, (B, m), jnp.float32)

    params = {
        # metric_network: Linear(m, H) -> ReLU -> Linear(H, m*m)
        "metric": init_linear(k1, m, H) + init_linear(k2, H, m * m),
        # christoffel_network (forward-implied): Linear(m+3, H) -> Tanh -> Linear(H, 1)
        "christoffel": init_linear(k3, m + 3, H) + init_linear(k4, H, 1),
        # ricci_network (forward-implied): Linear(2m+1, 2H) -> ReLU -> Linear(2H, 1)
        "ricci": init_linear(k5, 2 * m + 1, 2 * H) + init_linear(k6, 2 * H, 1),
    }

    out = ricci_tensor_network(points, params, m)
    jax.block_until_ready(out)
    assert out.shape == (B, m, m) and out.dtype == jnp.float32

    # validate against the f32 reference (loose bound: MXU inputs are bf16)
    ref = jax.jit(functools.partial(ricci_reference, m=m))(points, params)
    err = float(jnp.max(jnp.abs(out - ref)))
    assert err < 5e-2, f"max abs error vs f32 reference too large: {err}"

    print("KERNEL_OK")
</pallas_src>

<mosaic_0001>
module attributes {stable_mosaic.version = 11 : i64} {
  func.func @_ricci_fused_kernel(%arg0: i32, %arg1: memref<8x4xbf16, #tpu.memory_space<vmem>>, %arg2: memref<4x32xbf16, #tpu.memory_space<vmem>>, %arg3: memref<1x32xf32, #tpu.memory_space<vmem>>, %arg4: memref<32x16xbf16, #tpu.memory_space<vmem>>, %arg5: memref<1x16xf32, #tpu.memory_space<vmem>>, %arg6: memref<4x32xbf16, #tpu.memory_space<vmem>>, %arg7: memref<1x32xf32, #tpu.memory_space<vmem>>, %arg8: memref<4x64xbf16, #tpu.memory_space<vmem>>, %arg9: memref<1x64xf32, #tpu.memory_space<vmem>>, %arg10: memref<4x16x512xf32, #tpu.memory_space<vmem>>, %arg11: memref<512x16xf32, #tpu.memory_space<vmem>>, %arg12: memref<16x1024xf32, #tpu.memory_space<vmem>>, %arg13: memref<4x16x1024xf32, #tpu.memory_space<vmem>>, %arg14: memref<1024x16xf32, #tpu.memory_space<vmem>>, %arg15: memref<1x1xf32, #tpu.memory_space<vmem>>, %arg16: memref<1x1xf32, #tpu.memory_space<vmem>>, %arg17: memref<8x16xf32, #tpu.memory_space<vmem>>) attributes {dimension_semantics = [#tpu.dimension_semantics<parallel>], iteration_bounds = array<i64: 1>, scalar_prefetch = 0 : i64, scratch_operands = 0 : i64, tpu.core_type = #tpu.core_type<tc>, window_params = [{transform_indices = @transform_0, window_bounds = array<i64: 8, 4>}, {pipeline_mode = #tpu.pipeline_mode<synchronous>, transform_indices = @transform_1, window_bounds = array<i64: 4, 32>}, {pipeline_mode = #tpu.pipeline_mode<synchronous>, transform_indices = @transform_2, window_bounds = array<i64: 1, 32>}, {pipeline_mode = #tpu.pipeline_mode<synchronous>, transform_indices = @transform_3, window_bounds = array<i64: 32, 16>}, {pipeline_mode = #tpu.pipeline_mode<synchronous>, transform_indices = @transform_4, window_bounds = array<i64: 1, 16>}, {pipeline_mode = #tpu.pipeline_mode<synchronous>, transform_indices = @transform_5, window_bounds = array<i64: 4, 32>}, {pipeline_mode = #tpu.pipeline_mode<synchronous>, transform_indices = @transform_6, window_bounds = array<i64: 1, 32>}, {pipeline_mode = #tpu.pipeline_mode<synchronous>, transform_indices = @transform_7, window_bounds = array<i64: 4, 64>}, {pipeline_mode = #tpu.pipeline_mode<synchronous>, transform_indices = @transform_8, window_bounds = array<i64: 1, 64>}, {pipeline_mode = #tpu.pipeline_mode<synchronous>, transform_indices = @transform_9, window_bounds = array<i64: 4, 16, 512>}, {pipeline_mode = #tpu.pipeline_mode<synchronous>, transform_indices = @transform_10, window_bounds = array<i64: 512, 16>}, {pipeline_mode = #tpu.pipeline_mode<synchronous>, transform_indices = @transform_11, window_bounds = array<i64: 16, 1024>}, {pipeline_mode = #tpu.pipeline_mode<synchronous>, transform_indices = @transform_12, window_bounds = array<i64: 4, 16, 1024>}, {pipeline_mode = #tpu.pipeline_mode<synchronous>, transform_indices = @transform_13, window_bounds = array<i64: 1024, 16>}, {pipeline_mode = #tpu.pipeline_mode<synchronous>, transform_indices = @transform_14, window_bounds = array<i64: 1, 1>}, {pipeline_mode = #tpu.pipeline_mode<synchronous>, transform_indices = @transform_15, window_bounds = array<i64: 1, 1>}, {transform_indices = @transform_16, window_bounds = array<i64: 8, 16>}]} {
    %c0 = arith.constant 0 : index
    %c0_0 = arith.constant 0 : index
    %0 = vector.load %arg1[%c0, %c0_0] : memref<8x4xbf16, #tpu.memory_space<vmem>>, vector<8x4xbf16>
    %c0_1 = arith.constant 0 : index
    %c0_2 = arith.constant 0 : index
    %1 = vector.load %arg2[%c0_1, %c0_2] : memref<4x32xbf16, #tpu.memory_space<vmem>>, vector<4x32xbf16>
    %cst = arith.constant dense<0.000000e+00> : vector<8x32xf32>
    %2 = tpu.matmul %0, %1, %cst {dimension_numbers = #tpu.dot_dimension_numbers<[1], [0], [0], [1], [0, 0, 1, 1], [], []>} : vector<8x4xbf16>, vector<4x32xbf16>, vector<8x32xf32> -> vector<8x32xf32>
    %c0_3 = arith.constant 0 : index
    %c0_4 = arith.constant 0 : index
    %3 = vector.load %arg3[%c0_3, %c0_4] : memref<1x32xf32, #tpu.memory_space<vmem>>, vector<1x32xf32>
    %4 = vector.broadcast %3 : vector<1x32xf32> to vector<8x32xf32>
    %5 = arith.addf %2, %4 : vector<8x32xf32>
    %cst_5 = arith.constant 0.000000e+00 : f32
    %6 = vector.broadcast %cst_5 : f32 to vector<8x32xf32>
    %7 = arith.maximumf %5, %6 : vector<8x32xf32>
    %8 = arith.truncf %7 : vector<8x32xf32> to vector<8x32xbf16>
    %c0_6 = arith.constant 0 : index
    %c0_7 = arith.constant 0 : index
    %9 = vector.load %arg4[%c0_6, %c0_7] : memref<32x16xbf16, #tpu.memory_space<vmem>>, vector<32x16xbf16>
    %cst_8 = arith.constant dense<0.000000e+00> : vector<8x16xf32>
    %10 = tpu.matmul %8, %9, %cst_8 {dimension_numbers = #tpu.dot_dimension_numbers<[1], [0], [0], [1], [0, 0, 1, 1], [], []>} : vector<8x32xbf16>, vector<32x16xbf16>, vector<8x16xf32> -> vector<8x16xf32>
    %c0_9 = arith.constant 0 : index
    %c0_10 = arith.constant 0 : index
    %11 = vector.load %arg5[%c0_9, %c0_10] : memref<1x16xf32, #tpu.memory_space<vmem>>, vector<1x16xf32>
    %12 = vector.broadcast %11 : vector<1x16xf32> to vector<8x16xf32>
    %13 = arith.addf %10, %12 : vector<8x16xf32>
    %c0_11 = arith.constant 0 : index
    %c0_12 = arith.constant 0 : index
    %14 = vector.load %arg6[%c0_11, %c0_12] : memref<4x32xbf16, #tpu.memory_space<vmem>>, vector<4x32xbf16>
    %cst_13 = arith.constant dense<0.000000e+00> : vector<8x32xf32>
    %15 = tpu.matmul %0, %14, %cst_13 {dimension_numbers = #tpu.dot_dimension_numbers<[1], [0], [0], [1], [0, 0, 1, 1], [], []>} : vector<8x4xbf16>, vector<4x32xbf16>, vector<8x32xf32> -> vector<8x32xf32>
    %c0_14 = arith.constant 0 : index
    %c0_15 = arith.constant 0 : index
    %16 = vector.load %arg7[%c0_14, %c0_15] : memref<1x32xf32, #tpu.memory_space<vmem>>, vector<1x32xf32>
    %17 = vector.broadcast %16 : vector<1x32xf32> to vector<8x32xf32>
    %18 = arith.addf %15, %17 : vector<8x32xf32>
    %c0_16 = arith.constant 0 : index
    %c0_17 = arith.constant 0 : index
    %19 = vector.load %arg8[%c0_16, %c0_17] : memref<4x64xbf16, #tpu.memory_space<vmem>>, vector<4x64xbf16>
    %cst_18 = arith.constant dense<0.000000e+00> : vector<8x64xf32>
    %20 = tpu.matmul %0, %19, %cst_18 {dimension_numbers = #tpu.dot_dimension_numbers<[1], [0], [0], [1], [0, 0, 1, 1], [], []>} : vector<8x4xbf16>, vector<4x64xbf16>, vector<8x64xf32> -> vector<8x64xf32>
    %c0_19 = arith.constant 0 : index
    %c0_20 = arith.constant 0 : index
    %21 = vector.load %arg9[%c0_19, %c0_20] : memref<1x64xf32, #tpu.memory_space<vmem>>, vector<1x64xf32>
    %22 = vector.broadcast %21 : vector<1x64xf32> to vector<8x64xf32>
    %23 = arith.addf %20, %22 : vector<8x64xf32>
    %24 = tpu.concatenate %18, %18, %18, %18, %18, %18, %18, %18, %18, %18, %18, %18, %18, %18, %18, %18 in 1 : vector<8x32xf32>, vector<8x32xf32>, vector<8x32xf32>, vector<8x32xf32>, vector<8x32xf32>, vector<8x32xf32>, vector<8x32xf32>, vector<8x32xf32>, vector<8x32xf32>, vector<8x32xf32>, vector<8x32xf32>, vector<8x32xf32>, vector<8x32xf32>, vector<8x32xf32>, vector<8x32xf32>, vector<8x32xf32> -> vector<8x512xf32>
    %25 = tpu.concatenate %23, %23, %23, %23, %23, %23, %23, %23, %23, %23, %23, %23, %23, %23, %23, %23 in 1 : vector<8x64xf32>, vector<8x64xf32>, vector<8x64xf32>, vector<8x64xf32>, vector<8x64xf32>, vector<8x64xf32>, vector<8x64xf32>, vector<8x64xf32>, vector<8x64xf32>, vector<8x64xf32>, vector<8x64xf32>, vector<8x64xf32>, vector<8x64xf32>, vector<8x64xf32>, vector<8x64xf32>, vector<8x64xf32> -> vector<8x1024xf32>
    %c0_21 = arith.constant 0 : index
    %c0_22 = arith.constant 0 : index
    %26 = vector.load %arg15[%c0_21, %c0_22] : memref<1x1xf32, #tpu.memory_space<vmem>>, vector<1x1xf32>
    %c0_23 = arith.constant 0 : index
    %c0_24 = arith.constant 0 : index
    %27 = vector.load %arg16[%c0_23, %c0_24] : memref<1x1xf32, #tpu.memory_space<vmem>>, vector<1x1xf32>
    %c0_25 = arith.constant 0 : index
    %c0_26 = arith.constant 0 : index
    %28 = vector.load %arg12[%c0_25, %c0_26] : memref<16x1024xf32, #tpu.memory_space<vmem>>, vector<16x1024xf32>
    %cst_27 = arith.constant dense<0.000000e+00> : vector<8x1024xf32>
    %29 = tpu.matmul %13, %28, %cst_27 {dimension_numbers = #tpu.dot_dimension_numbers<[1], [0], [0], [1], [0, 0, 1, 1], [], []>} : vector<8x16xf32>, vector<16x1024xf32>, vector<8x1024xf32> -> vector<8x1024xf32>
    %30 = arith.addf %25, %29 : vector<8x1024xf32>
    %c0_28 = arith.constant 0 : index
    %c0_29 = arith.constant 0 : index
    %c0_30 = arith.constant 0 : index
    %31 = vector.load %arg10[%c0_28, %c0_29, %c0_30] : memref<4x16x512xf32, #tpu.memory_space<vmem>>, vector<1x16x512xf32>
    %32 = vector.shape_cast %31 : vector<1x16x512xf32> to vector<16x512xf32>
    %cst_31 = arith.constant dense<0.000000e+00> : vector<8x512xf32>
    %33 = tpu.matmul %13, %32, %cst_31 {dimension_numbers = #tpu.dot_dimension_numbers<[1], [0], [0], [1], [0, 0, 1, 1], [], []>} : vector<8x16xf32>, vector<16x512xf32>, vector<8x512xf32> -> vector<8x512xf32>
    %34 = arith.addf %24, %33 : vector<8x512xf32>
    %35 = math.tanh %34 : vector<8x512xf32>
    %c0_32 = arith.constant 0 : index
    %c0_33 = arith.constant 0 : index
    %36 = vector.load %arg11[%c0_32, %c0_33] : memref<512x16xf32, #tpu.memory_space<vmem>>, vector<512x16xf32>
    %cst_34 = arith.constant dense<0.000000e+00> : vector<8x16xf32>
    %37 = tpu.matmul %35, %36, %cst_34 {dimension_numbers = #tpu.dot_dimension_numbers<[1], [0], [0], [1], [0, 0, 1, 1], [], []>} : vector<8x512xf32>, vector<512x16xf32>, vector<8x16xf32> -> vector<8x16xf32>
    %38 = vector.broadcast %26 : vector<1x1xf32> to vector<8x16xf32>
    %39 = arith.addf %37, %38 : vector<8x16xf32>
    %c0_35 = arith.constant 0 : index
    %c0_36 = arith.constant 0 : index
    %c0_37 = arith.constant 0 : index
    %40 = vector.load %arg13[%c0_35, %c0_36, %c0_37] : memref<4x16x1024xf32, #tpu.memory_space<vmem>>, vector<1x16x1024xf32>
    %41 = vector.shape_cast %40 : vector<1x16x1024xf32> to vector<16x1024xf32>
    %cst_38 = arith.constant dense<0.000000e+00> : vector<8x1024xf32>
    %42 = tpu.matmul %39, %41, %cst_38 {dimension_numbers = #tpu.dot_dimension_numbers<[1], [0], [0], [1], [0, 0, 1, 1], [], []>} : vector<8x16xf32>, vector<16x1024xf32>, vector<8x1024xf32> -> vector<8x1024xf32>
    %43 = arith.addf %30, %42 : vector<8x1024xf32>
    %c1 = arith.constant 1 : index
    %c0_39 = arith.constant 0 : index
    %c0_40 = arith.constant 0 : index
    %44 = vector.load %arg10[%c1, %c0_39, %c0_40] : memref<4x16x512xf32, #tpu.memory_space<vmem>>, vector<1x16x512xf32>
    %45 = vector.shape_cast %44 : vector<1x16x512xf32> to vector<16x512xf32>
    %cst_41 = arith.constant dense<0.000000e+00> : vector<8x512xf32>
    %46 = tpu.matmul %13, %45, %cst_41 {dimension_numbers = #tpu.dot_dimension_numbers<[1], [0], [0], [1], [0, 0, 1, 1], [], []>} : vector<8x16xf32>, vector<16x512xf32>, vector<8x512xf32> -> vector<8x512xf32>
    %47 = arith.addf %24, %46 : vector<8x512xf32>
    %48 = math.tanh %47 : vector<8x512xf32>
    %c0_42 = arith.constant 0 : index
    %c0_43 = arith.constant 0 : index
    %49 = vector.load %arg11[%c0_42, %c0_43] : memref<512x16xf32, #tpu.memory_space<vmem>>, vector<512x16xf32>
    %cst_44 = arith.constant dense<0.000000e+00> : vector<8x16xf32>
    %50 = tpu.matmul %48, %49, %cst_44 {dimension_numbers = #tpu.dot_dimension_numbers<[1], [0], [0], [1], [0, 0, 1, 1], [], []>} : vector<8x512xf32>, vector<512x16xf32>, vector<8x16xf32> -> vector<8x16xf32>
    %51 = vector.broadcast %26 : vector<1x1xf32> to vector<8x16xf32>
    %52 = arith.addf %50, %51 : vector<8x16xf32>
    %c1_45 = arith.constant 1 : index
    %c0_46 = arith.constant 0 : index
    %c0_47 = arith.constant 0 : index
    %53 = vector.load %arg13[%c1_45, %c0_46, %c0_47] : memref<4x16x1024xf32, #tpu.memory_space<vmem>>, vector<1x16x1024xf32>
    %54 = vector.shape_cast %53 : vector<1x16x1024xf32> to vector<16x1024xf32>
    %cst_48 = arith.constant dense<0.000000e+00> : vector<8x1024xf32>
    %55 = tpu.matmul %52, %54, %cst_48 {dimension_numbers = #tpu.dot_dimension_numbers<[1], [0], [0], [1], [0, 0, 1, 1], [], []>} : vector<8x16xf32>, vector<16x1024xf32>, vector<8x1024xf32> -> vector<8x1024xf32>
    %56 = arith.addf %43, %55 : vector<8x1024xf32>
    %c2 = arith.constant 2 : index
    %c0_49 = arith.constant 0 : index
    %c0_50 = arith.constant 0 : index
    %57 = vector.load %arg10[%c2, %c0_49, %c0_50] : memref<4x16x512xf32, #tpu.memory_space<vmem>>, vector<1x16x512xf32>
    %58 = vector.shape_cast %57 : vector<1x16x512xf32> to vector<16x512xf32>
    %cst_51 = arith.constant dense<0.000000e+00> : vector<8x512xf32>
    %59 = tpu.matmul %13, %58, %cst_51 {dimension_numbers = #tpu.dot_dimension_numbers<[1], [0], [0], [1], [0, 0, 1, 1], [], []>} : vector<8x16xf32>, vector<16x512xf32>, vector<8x512xf32> -> vector<8x512xf32>
    %60 = arith.addf %24, %59 : vector<8x512xf32>
    %61 = math.tanh %60 : vector<8x512xf32>
    %c0_52 = arith.constant 0 : index
    %c0_53 = arith.constant 0 : index
    %62 = vector.load %arg11[%c0_52, %c0_53] : memref<512x16xf32, #tpu.memory_space<vmem>>, vector<512x16xf32>
    %cst_54 = arith.constant dense<0.000000e+00> : vector<8x16xf32>
    %63 = tpu.matmul %61, %62, %cst_54 {dimension_numbers = #tpu.dot_dimension_numbers<[1], [0], [0], [1], [0, 0, 1, 1], [], []>} : vector<8x512xf32>, vector<512x16xf32>, vector<8x16xf32> -> vector<8x16xf32>
    %64 = vector.broadcast %26 : vector<1x1xf32> to vector<8x16xf32>
    %65 = arith.addf %63, %64 : vector<8x16xf32>
    %c2_55 = arith.constant 2 : index
    %c0_56 = arith.constant 0 : index
    %c0_57 = arith.constant 0 : index
    %66 = vector.load %arg13[%c2_55, %c0_56, %c0_57] : memref<4x16x1024xf32, #tpu.memory_space<vmem>>, vector<1x16x1024xf32>
    %67 = vector.shape_cast %66 : vector<1x16x1024xf32> to vector<16x1024xf32>
    %cst_58 = arith.constant dense<0.000000e+00> : vector<8x1024xf32>
    %68 = tpu.matmul %65, %67, %cst_58 {dimension_numbers = #tpu.dot_dimension_numbers<[1], [0], [0], [1], [0, 0, 1, 1], [], []>} : vector<8x16xf32>, vector<16x1024xf32>, vector<8x1024xf32> -> vector<8x1024xf32>
    %69 = arith.addf %56, %68 : vector<8x1024xf32>
    %c3 = arith.constant 3 : index
    %c0_59 = arith.constant 0 : index
    %c0_60 = arith.constant 0 : index
    %70 = vector.load %arg10[%c3, %c0_59, %c0_60] : memref<4x16x512xf32, #tpu.memory_space<vmem>>, vector<1x16x512xf32>
    %71 = vector.shape_cast %70 : vector<1x16x512xf32> to vector<16x512xf32>
    %cst_61 = arith.constant dense<0.000000e+00> : vector<8x512xf32>
    %72 = tpu.matmul %13, %71, %cst_61 {dimension_numbers = #tpu.dot_dimension_numbers<[1], [0], [0], [1], [0, 0, 1, 1], [], []>} : vector<8x16xf32>, vector<16x512xf32>, vector<8x512xf32> -> vector<8x512xf32>
    %73 = arith.addf %24, %72 : vector<8x512xf32>
    %74 = math.tanh %73 : vector<8x512xf32>
    %c0_62 = arith.constant 0 : index
    %c0_63 = arith.constant 0 : index
    %75 = vector.load %arg11[%c0_62, %c0_63] : memref<512x16xf32, #tpu.memory_space<vmem>>, vector<512x16xf32>
    %cst_64 = arith.constant dense<0.000000e+00> : vector<8x16xf32>
    %76 = tpu.matmul %74, %75, %cst_64 {dimension_numbers = #tpu.dot_dimension_numbers<[1], [0], [0], [1], [0, 0, 1, 1], [], []>} : vector<8x512xf32>, vector<512x16xf32>, vector<8x16xf32> -> vector<8x16xf32>
    %77 = vector.broadcast %26 : vector<1x1xf32> to vector<8x16xf32>
    %78 = arith.addf %76, %77 : vector<8x16xf32>
    %c3_65 = arith.constant 3 : index
    %c0_66 = arith.constant 0 : index
    %c0_67 = arith.constant 0 : index
    %79 = vector.load %arg13[%c3_65, %c0_66, %c0_67] : memref<4x16x1024xf32, #tpu.memory_space<vmem>>, vector<1x16x1024xf32>
    %80 = vector.shape_cast %79 : vector<1x16x1024xf32> to vector<16x1024xf32>
    %cst_68 = arith.constant dense<0.000000e+00> : vector<8x1024xf32>
    %81 = tpu.matmul %78, %80, %cst_68 {dimension_numbers = #tpu.dot_dimension_numbers<[1], [0], [0], [1], [0, 0, 1, 1], [], []>} : vector<8x16xf32>, vector<16x1024xf32>, vector<8x1024xf32> -> vector<8x1024xf32>
    %82 = arith.addf %69, %81 : vector<8x1024xf32>
    %cst_69 = arith.constant 0.000000e+00 : f32
    %83 = vector.broadcast %cst_69 : f32 to vector<8x1024xf32>
    %84 = arith.maximumf %82, %83 : vector<8x1024xf32>
    %c0_70 = arith.constant 0 : index
    %c0_71 = arith.constant 0 : index
    %85 = vector.load %arg14[%c0_70, %c0_71] : memref<1024x16xf32, #tpu.memory_space<vmem>>, vector<1024x16xf32>
    %cst_72 = arith.constant dense<0.000000e+00> : vector<8x16xf32>
    %86 = tpu.matmul %84, %85, %cst_72 {dimension_numbers = #tpu.dot_dimension_numbers<[1], [0], [0], [1], [0, 0, 1, 1], [], []>} : vector<8x1024xf32>, vector<1024x16xf32>, vector<8x16xf32> -> vector<8x16xf32>
    %87 = vector.broadcast %27 : vector<1x1xf32> to vector<8x16xf32>
    %88 = arith.addf %86, %87 : vector<8x16xf32>
    %c0_73 = arith.constant 0 : index
    %c0_74 = arith.constant 0 : index
    %89 = vector.load %arg17[%c0_73, %c0_74] : memref<8x16xf32, #tpu.memory_space<vmem>>, vector<8x16xf32>
    tpu.vector_store %arg17[%c0_73, %c0_74], %88 {strides = array<i32>} : memref<8x16xf32, #tpu.memory_space<vmem>>, vector<8x16xf32>,
    return
  }
  func.func @transform_0(%arg0: i32) -> (i32, i32) {
    %c0_i32 = arith.constant 0 : i32
    %c0_i32_0 = arith.constant 0 : i32
    return %arg0, %c0_i32 : i32, i32
  }
  func.func @transform_1(%arg0: i32) -> (i32, i32) {
    %c0_i32 = arith.constant 0 : i32
    %c0_i32_0 = arith.constant 0 : i32
    %c0_i32_1 = arith.constant 0 : i32
    return %c0_i32, %c0_i32_0 : i32, i32
  }
  func.func @transform_2(%arg0: i32) -> (i32, i32) {
    %c0_i32 = arith.constant 0 : i32
    %c0_i32_0 = arith.constant 0 : i32
    %c0_i32_1 = arith.constant 0 : i32
    return %c0_i32, %c0_i32_0 : i32, i32
  }
  func.func @transform_3(%arg0: i32) -> (i32, i32) {
    %c0_i32 = arith.constant 0 : i32
    %c0_i32_0 = arith.constant 0 : i32
    %c0_i32_1 = arith.constant 0 : i32
    return %c0_i32, %c0_i32_0 : i32, i32
  }
  func.func @transform_4(%arg0: i32) -> (i32, i32) {
    %c0_i32 = arith.constant 0 : i32
    %c0_i32_0 = arith.constant 0 : i32
    %c0_i32_1 = arith.constant 0 : i32
    return %c0_i32, %c0_i32_0 : i32, i32
  }
  func.func @transform_5(%arg0: i32) -> (i32, i32) {
    %c0_i32 = arith.constant 0 : i32
    %c0_i32_0 = arith.constant 0 : i32
    %c0_i32_1 = arith.constant 0 : i32
    return %c0_i32, %c0_i32_0 : i32, i32
  }
  func.func @transform_6(%arg0: i32) -> (i32, i32) {
    %c0_i32 = arith.constant 0 : i32
    %c0_i32_0 = arith.constant 0 : i32
    %c0_i32_1 = arith.constant 0 : i32
    return %c0_i32, %c0_i32_0 : i32, i32
  }
  func.func @transform_7(%arg0: i32) -> (i32, i32) {
    %c0_i32 = arith.constant 0 : i32
    %c0_i32_0 = arith.constant 0 : i32
    %c0_i32_1 = arith.constant 0 : i32
    return %c0_i32, %c0_i32_0 : i32, i32
  }
  func.func @transform_8(%arg0: i32) -> (i32, i32) {
    %c0_i32 = arith.constant 0 : i32
    %c0_i32_0 = arith.constant 0 : i32
    %c0_i32_1 = arith.constant 0 : i32
    return %c0_i32, %c0_i32_0 : i32, i32
  }
  func.func @transform_9(%arg0: i32) -> (i32, i32, i32) {
    %c0_i32 = arith.constant 0 : i32
    %c0_i32_0 = arith.constant 0 : i32
    %c0_i32_1 = arith.constant 0 : i32
    %c0_i32_2 = arith.constant 0 : i32
    return %c0_i32, %c0_i32_0, %c0_i32_1 : i32, i32, i32
  }
  func.func @transform_10(%arg0: i32) -> (i32, i32) {
    %c0_i32 = arith.constant 0 : i32
    %c0_i32_0 = arith.constant 0 : i32
    %c0_i32_1 = arith.constant 0 : i32
    return %c0_i32, %c0_i32_0 : i32, i32
  }
  func.func @transform_11(%arg0: i32) -> (i32, i32) {
    %c0_i32 = arith.constant 0 : i32
    %c0_i32_0 = arith.constant 0 : i32
    %c0_i32_1 = arith.constant 0 : i32
    return %c0_i32, %c0_i32_0 : i32, i32
  }
  func.func @transform_12(%arg0: i32) -> (i32, i32, i32) {
    %c0_i32 = arith.constant 0 : i32
    %c0_i32_0 = arith.constant 0 : i32
    %c0_i32_1 = arith.constant 0 : i32
    %c0_i32_2 = arith.constant 0 : i32
    return %c0_i32, %c0_i32_0, %c0_i32_1 : i32, i32, i32
  }
  func.func @transform_13(%arg0: i32) -> (i32, i32) {
    %c0_i32 = arith.constant 0 : i32
    %c0_i32_0 = arith.constant 0 : i32
    %c0_i32_1 = arith.constant 0 : i32
    return %c0_i32, %c0_i32_0 : i32, i32
  }
  func.func @transform_14(%arg0: i32) -> (i32, i32) {
    %c0_i32 = arith.constant 0 : i32
    %c0_i32_0 = arith.constant 0 : i32
    %c0_i32_1 = arith.constant 0 : i32
    return %c0_i32, %c0_i32_0 : i32, i32
  }
  func.func @transform_15(%arg0: i32) -> (i32, i32) {
    %c0_i32 = arith.constant 0 : i32
    %c0_i32_0 = arith.constant 0 : i32
    %c0_i32_1 = arith.constant 0 : i32
    return %c0_i32, %c0_i32_0 : i32, i32
  }
  func.func @transform_16(%arg0: i32) -> (i32, i32) {
    %c0_i32 = arith.constant 0 : i32
    %c0_i32_0 = arith.constant 0 : i32
    return %arg0, %c0_i32 : i32, i32
  }
}

</mosaic_0001>

<bundles_post_ra>
// kernel: tpu_custom_call.1
= control target key start
LH: loop header
LB: loop body
LE: loop exit
PB: predicated region body
PF: predicated region fallthrough
CT: control target
= control target key end

     0   :  { %s6136_s0 = inlined_call_operand.vmem [shape: bf16[8,4], index: 0, kind: input, shape index: {}]   ;;  %s6137_s1 = inlined_call_operand.vmem [shape: bf16[4,32], index: 1, kind: input, shape index: {}]   ;;  %s6138_s2 = inlined_call_operand.vmem [shape: f32[1,32], index: 2, kind: input, shape index: {}]   ;;  %s6139_s3 = inlined_call_operand.vmem [shape: bf16[32,16], index: 3, kind: input, shape index: {}]   ;;  %s6140_s4 = inlined_call_operand.vmem [shape: f32[1,16], index: 4, kind: input, shape index: {}]   ;;  %s6141_s5 = inlined_call_operand.vmem [shape: bf16[4,32], index: 5, kind: input, shape index: {}]   ;;  %s6142_s6 = inlined_call_operand.vmem [shape: f32[1,32], index: 6, kind: input, shape index: {}]   ;;  %s6143_s7 = inlined_call_operand.vmem [shape: bf16[4,64], index: 7, kind: input, shape index: {}]   ;;  %s6144_s8 = inlined_call_operand.vmem [shape: f32[1,64], index: 8, kind: input, shape index: {}]   ;;  %s6145_s9 = inlined_call_operand.vmem [shape: f32[4,16,512], index: 9, kind: input, shape index: {}]   ;;  %s6146_s10 = inlined_call_operand.vmem [shape: f32[512,16], index: 10, kind: input, shape index: {}]   ;;  %s6147_s11 = inlined_call_operand.vmem [shape: f32[16,1024], index: 11, kind: input, shape index: {}]   ;;  %s6148_s12 = inlined_call_operand.vmem [shape: f32[4,16,1024], index: 12, kind: input, shape index: {}]   ;;  %s6149_s13 = inlined_call_operand.vmem [shape: f32[1024,16], index: 13, kind: input, shape index: {}]   ;;  %s6150_s14 = inlined_call_operand.<no memory space> [shape: f32[1,1], index: 14, kind: input, shape index: {}]   ;;  %s6151_s16 = inlined_call_operand.hbm [shape: f32[8,16], index: 16, kind: output, shape index: {}]   ;;  %s6152_s15 = inlined_call_operand.<no memory space> [shape: f32[1,1], index: 15, kind: input, shape index: {}]  }
   0x1   :  { %6153 = sst [smem:[#allocation7_spill]] %s6136_s0  ;;  %v21_v0 = vstv %s6150_s14  ;;  %v23_v1 = vstv %s6152_s15 }
   0x2   :  { %22 = vst [vmem:[#allocation2] sm:$0x1] %v21_v0  ;;  %24 = vst [vmem:[#allocation3] sm:$0x1] %v23_v1 }
   0x3   :  { %v60_v2 = vld [vmem:[%s6137_s1] sm:$0x3]  ;;  %vm72_vm0 = vcmask 1041408   ;;  %v4746_v3 = vmov 0.0   ;;  %vm4747_vm1 = vmmov 0   ;;  %s6154_s28 = sld [smem:[#allocation7_spill]] }
   0x4   :  { %4117 = vmatprep.subr.bf16.mxu1 %v4746_v3  ;;  %v74_v4 = vsel %vm72_vm0, %v60_v2, 0  ;;  %4119 = vmatprep.mubr.msk.bf16.mxu1 %vm4747_vm1, %v4746_v3  ;;  %vm68_vm2 = vcmask 31744   ;;  %v185_v6 = vld [vmem:[%s6141_s5] sm:$0x3] }
   0x5   :  { %4118 = vmatpush3.bf16.msra.mxu1 %v74_v4  ;;  %4131 = vmatprep.subr.bf16.mxu0 %v4746_v3  ;;  %v194_v7 = vsel %vm72_vm0, %v185_v6, 0  ;;  %v4688_v8 = vld [vmem:[%s6139_s3] sm:$0xff]  }
   0x6   :  { %4132 = vmatpush3.bf16.msra.mxu0 %v194_v7  ;;  %4133 = vmatprep.mubr.msk.bf16.mxu0 %vm4747_vm1, %v4746_v3 }
   0x7   :  { %4123 = vmatprep.subr.bf16.mxu1 %v4746_v3 }
   0x9   :  { %v59_v5 = vld [vmem:[%s6154_s28] sm:$0xf] }
   0xa   :  { %25 = vsyncpa [#allocation5], 0  ;;  %4120 = vmatmul.mubr.msk.bf16.vlgmr.msra.gmra.mrb[0].mxu1 %vm68_vm2, %v59_v5  ;;  %4134 = vmatmul.mubr.msk.bf16.vlgmr.msra.gmra.mrb[0].mxu0 %vm68_vm2, %v59_v5  ;;  %v4689_v9 = vld [vmem:[%s6139_s3 + $0x8] sm:$0xff]   ;;  %v309_v13 = vld [vmem:[%s6147_s11] sm:$0xff]  ;;  %vm141_vm3 = vcmask 261120   ;;  %s4749_s30 = smov 96  }
   0xb   :  { %4124 = vmatpush3.bf16.msra.mxu1 %v4688_v8  ;;  %4127 = vmatprep.mubr.msk.bf16.mxu1 %vm4747_vm1, %v4746_v3  ;;  %v310_v10 = vld [vmem:[%s6147_s11 + $0x8] sm:$0xff]  ;;  %v317_v14 = vld [vmem:[%s6147_s11 + $0x40] sm:$0xff]  ;;  %v312_v38 = vld [vmem:[%s6147_s11 + $0x18] sm:$0xff]  ;;  %vm325_vm4 = vcmask 130048   ;;  %vm298_vm5 = vcmask 523264   ;;  %vm300_vm6 = vcmask 785408  }
   0xc   :  { %4125 = vmatprep.subr.bf16.mxu1 %v4746_v3  ;;  %393 = vmatprep.mubr.f32.mxu0 %v4746_v3  ;;  %v318_v11 = vld [vmem:[%s6147_s11 + $0x48] sm:$0xff]  ;;  %v4145_v15 = vpack.c.bf16 %v317_v14, %v309_v13  ;;  %v3576_v16 = vld [vmem:[%s6138_s2] ss:$0 sm:$0xff]  ;;  %v320_v39 = vld [vmem:[%s6147_s11 + $0x58] sm:$0xff] }
   0xd   :  { %v4143_v12 = vpack.c.bf16 %v318_v11, %v310_v10  ;;  %v3582_v17 = vld [vmem:[%s6142_s6] ss:$0 sm:$0xff]  ;;  %v314_v25 = vld [vmem:[%s6147_s11 + $0x28] sm:$0xff]  ;;  %s4748_s6 = smov 32   ;;  %v4147_v41 = vpack.c.bf16 %v320_v39, %v312_v38  ;;  %v311_v44 = vld [vmem:[%s6147_s11 + $0x10] sm:$0xff] }
   0xe   :  { %v236_v23 = vld [vmem:[%s6143_s7] sm:$0x3]  ;;  %v322_v26 = vld [vmem:[%s6147_s11 + $0x68] sm:$0xff]  ;;  %s4750_s7 = smov 64   ;;  %v319_v45 = vld [vmem:[%s6147_s11 + $0x50] sm:$0xff] }
   0xf   :  { %4126 = vmatpush3.bf16.msra.mxu1 %v4689_v9  ;;  %4144 = vmatprep.subr.bf16.mxu0 %v4143_v12  ;;  %v245_v33 = vsel %vm72_vm0, %v236_v23, 0  ;;  %v4151_v34 = vpack.c.bf16 %v322_v26, %v314_v25  ;;  %v313_v35 = vld [vmem:[%s6147_s11 + $0x20] sm:$0xff]  ;;  %v622_v40 = vld [vmem:[%s6145_s9 + $0x8] sm:$0xff]  ;;  %v316_v49 = vld [vmem:[%s6147_s11 + $0x38] sm:$0xff]  ;;  %v4149_v54 = vpack.c.bf16 %v319_v45, %v311_v44 }
  0x10   :  { %4137 = vmatprep.subr.bf16.mxu1 %v4746_v3  ;;  %4146 = vmatpush1.bf16.msra.mxu0 %v4145_v15  ;;  %v321_v36 = vld [vmem:[%s6147_s11 + $0x60] sm:$0xff]  ;;  %v626_v42 = vld [vmem:[%s6145_s9 + $0x28] sm:$0xff]  ;;  %v324_v50 = vld [vmem:[%s6147_s11 + $0x78] sm:$0xff] }
  0x11   :  { %v4153_v37 = vpack.c.bf16 %v321_v36, %v313_v35  ;;  %v4159_v43 = vpack.c.bf16 %v626_v42, %v622_v40  ;;  %4148 = vmatprep.subr.bf16.mxu0 %v4147_v41  ;;  %v621_v46 = vld [vmem:[%s6145_s9] sm:$0xff]  ;;  %v796_v52 = vld [vmem:[%s6146_s10 + $0x88] sm:$0xff]  ;;  %v4155_v58 = vpack.c.bf16 %v324_v50, %v316_v49  ;;  %v315_v59 = vld [vmem:[%s6147_s11 + $0x30] sm:$0xff] }
  0x12   :  { %v625_v47 = vld [vmem:[%s6145_s9 + $0x20] sm:$0xff]  ;;  %v323_v60 = vld [vmem:[%s6147_s11 + $0x70] sm:$0xff]  ;;  %v624_v61 = vld [vmem:[%s6145_s9 + $0x18] sm:$0xff] }
  0x13   :  { %v3578_v48 = vld [vmem:[%s6140_s4] ss:$0 sm:$0xff]  ;;  %v4161_v55 = vpack.c.bf16 %v625_v47, %v621_v46  ;;  %v628_v63 = vld [vmem:[%s6145_s9 + $0x38] sm:$0xff]  ;;  %v780_v2 = vld [vmem:[%s6146_s10 + $0x8] sm:$0xff]  ;;  %v4157_v7 = vpack.c.bf16 %v323_v60, %v315_v59 }
  0x14   :  { %v795_v51 = vld [vmem:[%s6146_s10 + $0x80] sm:$0xff]  ;;  %v798_v6 = vld [vmem:[%s6146_s10 + $0x98] sm:$0xff]  ;;  %v623_v8 = vld [vmem:[%s6145_s9 + $0x10] sm:$0xff]  ;;  %v4163_v9 = vpack.c.bf16 %v628_v63, %v624_v61 }
  0x15   :  { %v4973_v0 = vpack.c.bf16 %v796_v52, %v795_v51  ;;  %v779_v1 = vld [vmem:[%s6146_s10] sm:$0xff]  ;;  %v627_v10 = vld [vmem:[%s6145_s9 + $0x30] sm:$0xff]  ;;  %v782_v15 = vld [vmem:[%s6146_s10 + $0x18] sm:$0xff] }
  0x16   :  { %v3584_v11 = vld [vmem:[%s6144_s8] ss:$0 sm:$0xff]  ;;  %v5001_v12 = vpack.c.bf16 %v780_v2, %v779_v1  ;;  %v781_v13 = vld [vmem:[%s6146_s10 + $0x10] sm:$0xff]  ;;  %v814_v42 = vld [vmem:[%s6146_s10 + $0x118] sm:$0xff] }
  0x17   :  { %v5033_v23 = vpack.c.bf16 %v782_v15, %v781_v13  ;;  %v801_v36 = vld [vmem:[%s6146_s10 + $0xb0] sm:$0xff]  ;;  %v786_v45 = vld [vmem:[%s6146_s10 + $0x38] sm:$0xff]  ;;  %v804_v49 = vld [vmem:[%s6146_s10 + $0xc8] sm:$0xff] }
  0x18   :  { %v813_v41 = vld [vmem:[%s6146_s10 + $0x110] sm:$0xff]  ;;  %v831_v50 = vld [vmem:[%s6146_s10 + $0x1a0] sm:$0xff]  ;;  %v832_v52 = vld [vmem:[%s6146_s10 + $0x1a8] sm:$0xff] }
  0x19   :  { %v785_v44 = vld [vmem:[%s6146_s10 + $0x30] sm:$0xff]  ;;  %v5095_v46 = vpack.c.bf16 %v814_v42, %v813_v41  ;;  %v816_v59 = vld [vmem:[%s6146_s10 + $0x128] sm:$0xff]  ;;  %v834_v2 = vld [vmem:[%s6146_s10 + $0x1b8] sm:$0xff] }
  0x1a   :  { %v5099_v47 = vpack.c.bf16 %v786_v45, %v785_v44  ;;  %v805_v61 = vld [vmem:[%s6146_s10 + $0xd0] sm:$0xff]  ;;  %v808_v13 = vld [vmem:[%s6146_s10 + $0xe8] sm:$0xff]  ;;  %v835_v15 = vld [vmem:[%s6146_s10 + $0x1c0] sm:$0xff] }
  0x1b   :  { %v833_v63 = vld [vmem:[%s6146_s10 + $0x1b0] sm:$0xff]  ;;  %v822_v44 = vld [vmem:[%s6146_s10 + $0x158] sm:$0xff] }
  0x1c   :  { %v821_v42 = vld [vmem:[%s6146_s10 + $0x150] sm:$0xff] }
  0x1d   :  { %v5243_v45 = vpack.c.bf16 %v822_v44, %v821_v42 }
  0xdd   :  { %v110_v18 = vpop.f32.mrb[0].mxu1  ;;  %v230_v21 = vpop.f32.mrb[0].mxu0 }
  0xde   :  { %v111_v19 = vadd.f32 %v3576_v16, %v110_v18  ;;  %v4121_v20 = vpop.f32.mrb[1].mxu1  ;;  %v4896_v24 = vadd.f32 %v3582_v17, %v230_v21  ;;  %v4135_v27 = vpop.f32.mrb[1].mxu0  ;;  %v827_v16 = vld [vmem:[%s6146_s10 + $0x180] sm:$0xff]  ;;  %v828_v17 = vld [vmem:[%s6146_s10 + $0x188] sm:$0xff] }
  0xdf   :  { %v113_v22 = vpop.f32.mrb[2].mxu1  ;;  %v233_v30 = vpop.f32.mrb[2].mxu0  ;;  %v799_v18 = vld [vmem:[%s6146_s10 + $0xa0] sm:$0xff]  ;;  %v4165_v20 = vpack.c.bf16 %v627_v10, %v623_v8  ;;  %v5035_v26 = vpack.c.bf16 %v828_v17, %v827_v16  ;;  %v817_v8 = vld [vmem:[%s6146_s10 + $0x130] sm:$0xff]  ;;  %v836_v17 = vld [vmem:[%s6146_s10 + $0x1c8] sm:$0xff] }
  0xe0   :  { %v116_v28 = vmax.f32 %v111_v19, 0.0  ;;  %v4122_v29 = vpop.f32.mrb[3].mxu1  ;;  %288 = vrot.lane.b32.xlu0 %v4896_v24, %s4748_s6  ;;  %294 = vrot.lane.b32.xlu1 %v4896_v24, %s4749_s30  ;;  %v4136_v31 = vpop.f32.mrb[3].mxu0  ;;  %v800_v19 = vld [vmem:[%s6146_s10 + $0xa8] sm:$0xff]  ;;  %v783_v27 = vld [vmem:[%s6146_s10 + $0x20] sm:$0xff] }
  0xe1   :  { %v812_v29 = vld [vmem:[%s6146_s10 + $0x108] sm:$0xff]  ;;  %v5047_v30 = vpack.c.bf16 %v800_v19, %v799_v18  ;;  %v791_v18 = vld [vmem:[%s6146_s10 + $0x60] sm:$0xff] }
  0xe2   :  { %v117_v32 = vpack.c.bf16 %v116_v28, %v116_v28  ;;  %v811_v28 = vld [vmem:[%s6146_s10 + $0x100] sm:$0xff]  ;;  %v792_v19 = vld [vmem:[%s6146_s10 + $0x68] sm:$0xff] }
  0xe3   :  { %v5069_v38 = vpack.c.bf16 %v812_v29, %v811_v28  ;;  %v809_v29 = vld [vmem:[%s6146_s10 + $0xf0] sm:$0xff] }
  0xe4   :  { %4128 = vmatmul.mubr.msk.bf16.vlgmr.msra.gmra.mrb[4].mxu1 %vm141_vm3, %v117_v32  ;;  %291 = vrot.lane.b32.xlu0 %v4896_v24, %s4750_s7  ;;  %v784_v32 = vld [vmem:[%s6146_s10 + $0x28] sm:$0xff] }
  0xe5   :  { %4138 = vmatpush3.bf16.msra.mxu1 %v245_v33  ;;  %4139 = vmatprep.mubr.msk.bf16.mxu1 %vm4747_vm1, %v4746_v3  ;;  %v829_v33 = vld [vmem:[%s6146_s10 + $0x190] sm:$0xff]  ;;  %v5073_v39 = vpack.c.bf16 %v784_v32, %v783_v27  ;;  %v820_v27 = vld [vmem:[%s6146_s10 + $0x148] sm:$0xff] }
  0xe6   :  { %4152 = vmatprep.subr.bf16.mxu1 %v4151_v34  ;;  %v830_v34 = vld [vmem:[%s6146_s10 + $0x198] sm:$0xff]  ;;  %v837_v32 = vld [vmem:[%s6146_s10 + $0x1d0] sm:$0xff] }
  0xe7   :  { %v5075_v40 = vpack.c.bf16 %v830_v34, %v829_v33  ;;  %v838_v34 = vld [vmem:[%s6146_s10 + $0x1d8] sm:$0xff] }
  0xec   :  { %4140 = vmatmul.mubr.msk.bf16.vlgmr.msra.gmra.mrb[8].mxu1 %vm68_vm2, %v59_v5  ;;  %v797_v5 = vld [vmem:[%s6146_s10 + $0x90] sm:$0xff] }
  0xed   :  { %535 = vmatprep.mubr.f32.mxu1 %v4746_v3  ;;  %4154 = vmatpush1.bf16.msra.mxu1 %v4153_v37  ;;  %v5008_v14 = vpack.c.bf16 %v798_v6, %v797_v5  ;;  %v802_v37 = vld [vmem:[%s6146_s10 + $0xb8] sm:$0xff]  ;;  %v5160_v6 = vpack.c.bf16 %v834_v2, %v833_v63 }
  0xee   :  { %4160 = vmatprep.subr.bf16.mxu1 %v4159_v43  ;;  %v5084_v43 = vpack.c.bf16 %v802_v37, %v801_v36  ;;  %v790_v5 = vld [vmem:[%s6146_s10 + $0x58] sm:$0xff]  ;;  %v5232_v37 = vpack.c.bf16 %v838_v34, %v837_v32 }
  0xef   :  { %v794_v36 = vld [vmem:[%s6146_s10 + $0x78] sm:$0xff] }
  0xf0   :  { %v826_v63 = vld [vmem:[%s6146_s10 + $0x178] sm:$0xff] }
 0x1b7   :  { %v179_v53 = vpop.f32.mrb[4].mxu1 }
 0x1b8   :  { %v4959_v56 = vadd.f32 %v3578_v48, %v179_v53  ;;  %v4129_v57 = vpop.f32.mrb[5].mxu1  ;;  %v803_v48 = vld [vmem:[%s6146_s10 + $0xc0] sm:$0xff] }
 0x1b9   :  { %v182_v62 = vpop.f32.mrb[6].mxu1  ;;  %v5113_v51 = vpack.c.bf16 %v804_v49, %v803_v48  ;;  %v787_v53 = vld [vmem:[%s6146_s10 + $0x40] sm:$0xff]  ;;  %v840_v49 = vld [vmem:[%s6146_s10 + $0x1e8] sm:$0xff] }
 0x1ba   :  { %v4130_v4 = vpop.f32.mrb[7].mxu1  ;;  %3586 = vmatmul.mubr.msk.f32.vlgmr.msra.gmra.mrb[4].mxu0 %vm325_vm4, %v4959_v56  ;;  %3588 = vmatmul.mubr.msk.f32.vlgmr.msra.gmra.mrb[12].mxu1 %vm325_vm4, %v4959_v56  ;;  %v806_v62 = vld [vmem:[%s6146_s10 + $0xd8] sm:$0xff]  ;;  %v839_v48 = vld [vmem:[%s6146_s10 + $0x1e0] sm:$0xff] }
 0x1bb   :  { %4150 = vmatpush1.bf16.msra.mxu0 %v4149_v54  ;;  %4162 = vmatpush1.bf16.msra.mxu1 %v4161_v55  ;;  %v788_v54 = vld [vmem:[%s6146_s10 + $0x48] sm:$0xff]  ;;  %v5124_v55 = vpack.c.bf16 %v832_v52, %v831_v50  ;;  %v5149_v1 = vpack.c.bf16 %v806_v62, %v805_v61  ;;  %v789_v4 = vld [vmem:[%s6146_s10 + $0x50] sm:$0xff]  ;;  %v5254_v50 = vpack.c.bf16 %v840_v49, %v839_v48  ;;  %v823_v52 = vld [vmem:[%s6146_s10 + $0x160] sm:$0xff] }
 0x1bc   :  { %464 = vmatprep.mubr.f32.mxu0 %v4746_v3  ;;  %4156 = vmatprep.subr.bf16.mxu0 %v4155_v58  ;;  %v5126_v57 = vpack.c.bf16 %v788_v54, %v787_v53  ;;  %v815_v58 = vld [vmem:[%s6146_s10 + $0x120] sm:$0xff]  ;;  %v824_v53 = vld [vmem:[%s6146_s10 + $0x168] sm:$0xff]  ;;  %v825_v61 = vld [vmem:[%s6146_s10 + $0x170] sm:$0xff] }
 0x1bd   :  { %693 = vmatprep.mubr.f32.mxu1 %v4746_v3  ;;  %4168 = vmatprep.subr.bf16.mxu1 %v4973_v0  ;;  %v5135_v60 = vpack.c.bf16 %v816_v59, %v815_v58  ;;  %v5262_v54 = vpack.c.bf16 %v824_v53, %v823_v52  ;;  %v841_v58 = vld [vmem:[%s6146_s10 + $0x1f0] sm:$0xff]  ;;  %v842_v59 = vld [vmem:[%s6146_s10 + $0x1f8] sm:$0xff]  ;;  %v5280_v2 = vpack.c.bf16 %v826_v63, %v825_v61  ;;  %v997_v48 = vld [vmem:[%s6148_s12 + $0x28] sm:$0xff] }
 0x1be   :  { %3587 = vmatmul.mubr.msk.f32.vlgmr.msra.gmra.mrb[6].mxu0 %vm325_vm4, %v4959_v56  ;;  %3590 = vmatmul.mubr.msk.f32.vlgmr.msra.gmra.mrb[14].mxu1 %vm325_vm4, %v4959_v56  ;;  %v5274_v62 = vpack.c.bf16 %v842_v59, %v841_v58  ;;  %v1005_v49 = vld [vmem:[%s6148_s12 + $0x68] sm:$0xff]  ;;  %v996_v59 = vld [vmem:[%s6148_s12 + $0x20] sm:$0xff] }
 0x1bf   :  { %4158 = vmatpush1.bf16.msra.mxu0 %v4157_v7  ;;  %606 = vmatprep.mubr.f32.mxu0 %v4746_v3  ;;  %v281_v21 = vpop.f32.mrb[8].mxu1  ;;  %v5162_v7 = vpack.c.bf16 %v790_v5, %v789_v4  ;;  %v3592_v4 = vld [vmem:[#allocation2] ss:$0 sm:$0xff]  ;;  %v4751_v5 = vmov 0   ;;  %v993_v52 = vld [vmem:[%s6148_s12 + $0x8] sm:$0xff]  ;;  %v4239_v53 = vpack.c.bf16 %v1005_v49, %v997_v48  ;;  %v3600_v48 = vld [vmem:[%s6145_s9 + $0x58] sm:$0xff] }
 0x1c0   :  { %4164 = vmatprep.subr.bf16.mxu0 %v4163_v9  ;;  %v5030_v22 = vadd.f32 %v3584_v11, %v281_v21  ;;  %4170 = vmatpush3.bf16.msra.mxu1 %v5001_v12  ;;  %v4141_v25 = vpop.f32.mrb[9].mxu1  ;;  %v818_v9 = vld [vmem:[%s6146_s10 + $0x138] sm:$0xff]  ;;  %v807_v11 = vld [vmem:[%s6146_s10 + $0xe0] sm:$0xff]  ;;  %v5198_v21 = vpack.c.bf16 %v792_v19, %v791_v18  ;;  %v1001_v58 = vld [vmem:[%s6148_s12 + $0x48] sm:$0xff] }
 0x1c1   :  { %4172 = vmatprep.subr.bf16.mxu1 %v5008_v14  ;;  %v284_v31 = vpop.f32.mrb[10].mxu1  ;;  %v5171_v10 = vpack.c.bf16 %v818_v9, %v817_v8  ;;  %v5185_v16 = vpack.c.bf16 %v808_v13, %v807_v11  ;;  %v819_v25 = vld [vmem:[%s6146_s10 + $0x140] sm:$0xff]  ;;  %4686 = vset.pattern.permute.xlu1 %v4751_v5  ;;  %v289_v9 = vpop.permute.xlu0 %288  ;;  %v4231_v63 = vpack.c.bf16 %v1001_v58, %v993_v52  ;;  %v999_v58 = vld [vmem:[%s6148_s12 + $0x38] sm:$0xff] }
 0x1c2   :  { %3589 = vmatmul.mubr.msk.f32.vlgmr.msra.gmra.mrb[8].mxu0 %vm325_vm4, %v4959_v56  ;;  %303 = vrot.lane.b32.xlu0 %v5030_v22, %s4750_s7  ;;  %v4142_v35 = vpop.f32.mrb[11].mxu1  ;;  %v5207_v28 = vpack.c.bf16 %v820_v27, %v819_v25  ;;  %v810_v31 = vld [vmem:[%s6146_s10 + $0xf8] sm:$0xff]  ;;  %v3687_v8 = vld [vmem:[#allocation3] ss:$0 sm:$0xff]  ;;  %v297_v11 = vsel %vm141_vm3, %v4896_v24, %v289_v9 }
 0x1c3   :  { %4166 = vmatpush1.bf16.msra.mxu0 %v4165_v20  ;;  %764 = vmatprep.mubr.f32.mxu0 %v4746_v3  ;;  %v5196_v20 = vpack.c.bf16 %v836_v17, %v835_v15  ;;  %v5221_v33 = vpack.c.bf16 %v810_v31, %v809_v29  ;;  %v793_v35 = vld [vmem:[%s6146_s10 + $0x70] sm:$0xff]  ;;  %v295_v17 = vpop.permute.xlu1 %294  ;;  %v1004_v61 = vld [vmem:[%s6148_s12 + $0x60] sm:$0xff] }
 0x1c4   :  { %4174 = vmatpush3.bf16.msra.mxu1 %v5033_v23  ;;  %4200 = vmatprep.subr.bf16.mxu0 %v5035_v26  ;;  %v5234_v41 = vpack.c.bf16 %v794_v36, %v793_v35 }
 0x1c5   :  { %4176 = vmatprep.subr.bf16.mxu1 %v5047_v30  ;;  %4687 = vset.pattern.permute.xlu0 %v4751_v5  ;;  %v292_v13 = vpop.permute.xlu0 %291  ;;  %v992_v5 = vld [vmem:[%s6148_s12] sm:$0xff] }
 0x1c6   :  { %3591 = vmatmul.mubr.msk.f32.vlgmr.msra.gmra.mrb[10].mxu0 %vm325_vm4, %v4959_v56  ;;  %849 = vperm.xlu1 %4686, %v3592_v4   ;;  %v299_v15 = vsel %vm298_vm5, %v297_v11, %v292_v13  ;;  %v4241_v4 = vpack.c.bf16 %v1004_v61, %v996_v59  ;;  %v3598_v11 = vld [vmem:[%s6145_s9 + $0x48] sm:$0xff]  ;;  %v1007_v59 = vld [vmem:[%s6148_s12 + $0x78] sm:$0xff] }
 0x1c7   :  { %4202 = vmatpush3.bf16.msra.mxu0 %v5069_v38  ;;  %v5287_v18 = vsel %vm300_vm6, %v299_v15, %v295_v17  ;;  %v3602_v13 = vld [vmem:[%s6145_s9 + $0x68] sm:$0xff]  ;;  %v995_v15 = vld [vmem:[%s6148_s12 + $0x18] sm:$0xff] }
 0x1c8   :  { %4178 = vmatpush3.bf16.msra.mxu1 %v5073_v39  ;;  %4204 = vmatprep.subr.bf16.mxu0 %v5075_v40  ;;  %v4247_v17 = vpack.c.bf16 %v3602_v13, %v3598_v11  ;;  %v1006_v11 = vld [vmem:[%s6148_s12 + $0x70] sm:$0xff] }
 0x1c9   :  { %4180 = vmatprep.subr.bf16.mxu1 %v5084_v43 }
 0x1ca   :  { %3278 = vperm.xlu1 %4686, %v3687_v8   ;;  %v1000_v8 = vld [vmem:[%s6148_s12 + $0x40] sm:$0xff] }
 0x1cb   :  { %4206 = vmatpush3.bf16.msra.mxu0 %v5095_v46  ;;  %v4233_v9 = vpack.c.bf16 %v1000_v8, %v992_v5  ;;  %v3603_v8 = vld [vmem:[%s6145_s9 + $0x70] sm:$0xff] }
 0x1cc   :  { %4182 = vmatpush3.bf16.msra.mxu1 %v5099_v47  ;;  %4208 = vmatprep.subr.bf16.mxu0 %v5124_v55 }
 0x1cd   :  { %4184 = vmatprep.subr.bf16.mxu1 %v5113_v51 }
 0x1cf   :  { %4210 = vmatpush3.bf16.msra.mxu0 %v5135_v60 }
 0x1d0   :  { %4186 = vmatpush3.bf16.msra.mxu1 %v5126_v57  ;;  %4212 = vmatprep.subr.bf16.mxu0 %v5160_v6 }
 0x1d1   :  { %4188 = vmatprep.subr.bf16.mxu1 %v5149_v1 }
 0x1d3   :  { %4214 = vmatpush3.bf16.msra.mxu0 %v5171_v10 }
 0x1d4   :  { %4190 = vmatpush3.bf16.msra.mxu1 %v5162_v7  ;;  %4216 = vmatprep.subr.bf16.mxu0 %v5196_v20 }
 0x1d5   :  { %4192 = vmatprep.subr.bf16.mxu1 %v5185_v16 }
 0x1d7   :  { %4218 = vmatpush3.bf16.msra.mxu0 %v5207_v28 }
 0x1d8   :  { %4194 = vmatpush3.bf16.msra.mxu1 %v5198_v21  ;;  %4220 = vmatprep.subr.bf16.mxu0 %v5232_v37 }
 0x1d9   :  { %4196 = vmatprep.subr.bf16.mxu1 %v5221_v33 }
 0x1db   :  { %4222 = vmatpush3.bf16.msra.mxu0 %v5243_v45 }
 0x1dc   :  { %4198 = vmatpush3.bf16.msra.mxu1 %v5234_v41  ;;  %4224 = vmatprep.subr.bf16.mxu0 %v5254_v50 }
 0x1dd   :  { %4240 = vmatprep.subr.bf16.mxu1 %v4239_v53  ;;  %v3604_v53 = vld [vmem:[%s6145_s9 + $0x78] sm:$0xff] }
 0x1de   :  { %v4251_v13 = vpack.c.bf16 %v3604_v53, %v3600_v48  ;;  %v3620_v53 = vld [vmem:[%s6148_s12 + $0xe8] sm:$0xff] }
 0x1df   :  { %4226 = vmatpush3.bf16.msra.mxu0 %v5262_v54 }
 0x1e0   :  { %4228 = vmatprep.subr.bf16.mxu0 %v5274_v62 }
 0x1e3   :  { %4230 = vmatpush3.bf16.msra.mxu0 %v5280_v2 }
 0x1e4   :  { %4232 = vmatprep.subr.bf16.mxu0 %v4231_v63 }
 0x291   :  { %v695_v19 = vpop.f32.mrb[14].mxu1 }
 0x292   :  { %v771_v25 = vadd.f32 %v695_v19, %v5287_v18  ;;  %v697_v27 = vpop.f32.mrb[15].mxu1  ;;  %v1003_v19 = vld [vmem:[%s6148_s12 + $0x58] sm:$0xff] }
 0x293   :  { %v772_v29 = vadd.f32 %v697_v27, %v5287_v18 }
 0x295   :  { %4690 = vtanh.f32 %v772_v29 }
 0x296   :  { %4692 = vtanh.f32 %v771_v25  ;;  %v4235_v25 = vpack.c.bf16 %v1003_v19, %v995_v15  ;;  %v4243_v15 = vpack.c.bf16 %v1007_v59, %v999_v58  ;;  %v3608_v58 = vld [vmem:[%s6148_s12 + $0x88] sm:$0xff] }
 0x299   :  { %v766_v31 = vpop.f32.mrb[10].mxu0 }
 0x29a   :  { %v773_v32 = vadd.f32 %v766_v31, %v5287_v18  ;;  %v768_v24 = vpop.f32.mrb[11].mxu0 }
 0x29b   :  { %v774_v34 = vadd.f32 %v768_v24, %v5287_v18  ;;  %v3597_v24 = vld [vmem:[%s6145_s9 + $0x40] sm:$0xff] }
 0x29d   :  { %4694 = vtanh.f32 %v774_v34 }
 0x29e   :  { %4696 = vtanh.f32 %v773_v32  ;;  %v5331_v32 = vpop.permute.xlu1 %849 }
 0x29f   :  { %v4691_v35 = vpop.eup %4690 }
 0x2a0   :  { %v4693_v36 = vpop.eup %4692  ;;  %916 = vmatprep.mubr.f32.mxu1 %v4691_v35  ;;  %v3601_v35 = vld [vmem:[%s6145_s9 + $0x60] sm:$0xff] }
 0x2a1   :  { %917 = vmatmul.mubr.f32.vlgmr.msra.gmra.mrb[16].mxu1 %v4693_v36  ;;  %v994_v36 = vld [vmem:[%s6148_s12 + $0x10] sm:$0xff]  ;;  %v4249_v61 = vpack.c.bf16 %v3601_v35, %v3597_v24 }
 0x2a2   :  { %1217 = vmatprep.mubr.f32.mxu1 %v4746_v3  ;;  %4242 = vmatpush1.bf16.msra.mxu1 %v4241_v4  ;;  %v3599_v4 = vld [vmem:[%s6145_s9 + $0x50] sm:$0xff] }
 0x2a3   :  { %4248 = vmatprep.subr.bf16.mxu1 %v4247_v17  ;;  %v4253_v17 = vpack.c.bf16 %v3603_v8, %v3599_v4  ;;  %v3619_v4 = vld [vmem:[%s6148_s12 + $0xe0] sm:$0xff] }
 0x2a7   :  { %v4695_v42 = vpop.eup %4694 }
 0x2a8   :  { %v4697_v44 = vpop.eup %4696  ;;  %986 = vmatprep.mubr.f32.mxu0 %v4695_v42  ;;  %v1002_v42 = vld [vmem:[%s6148_s12 + $0x50] sm:$0xff] }
 0x2a9   :  { %987 = vmatmul.mubr.f32.vlgmr.msra.gmra.mrb[12].mxu0 %v4697_v44  ;;  %v4237_v63 = vpack.c.bf16 %v1002_v42, %v994_v36 }
 0x2aa   :  { %1075 = vmatprep.mubr.f32.mxu0 %v4746_v3  ;;  %4234 = vmatpush1.bf16.msra.mxu0 %v4233_v9  ;;  %v998_v9 = vld [vmem:[%s6148_s12 + $0x30] sm:$0xff] }
 0x2ab   :  { %4236 = vmatprep.subr.bf16.mxu0 %v4235_v25  ;;  %v4245_v19 = vpack.c.bf16 %v1006_v11, %v998_v9  ;;  %v3607_v9 = vld [vmem:[%s6148_s12 + $0x80] sm:$0xff] }
 0x2ac   :  { %v3615_v11 = vld [vmem:[%s6148_s12 + $0xc0] sm:$0xff] }
 0x374   :  { %v3729_v27 = vpop.f32.mrb[16].mxu1 }
 0x375   :  { %v3730_v29 = vpop.f32.mrb[17].mxu1 }
 0x376   :  { %v3731_v31 = vadd.f32 %v3730_v29, %v3729_v27 }
 0x378   :  { %v919_v49 = vadd.f32 %v3731_v31, %v5331_v32 }
 0x37c   :  { %v3764_v34 = vpop.f32.mrb[12].mxu0 }
 0x37d   :  { %v3765_v44 = vpop.f32.mrb[13].mxu0 }
 0x37e   :  { %v3766_v52 = vadd.f32 %v3765_v44, %v3764_v34 }
 0x380   :  { %v989_v5 = vadd.f32 %v3766_v52, %v919_v49  ;;  %v3612_v52 = vld [vmem:[%s6148_s12 + $0xa8] sm:$0xff] }
 0x381   :  { %v4327_v59 = vpack.c.bf16 %v3620_v53, %v3612_v52  ;;  %v3630_v52 = vld [vmem:[%s6145_s9 + $0x98] sm:$0xff] }
 0x382   :  { %3593 = vmatmul.mubr.msk.f32.vlgmr.msra.gmra.mrb[4].mxu0 %vm325_vm4, %v989_v5  ;;  %3595 = vmatmul.mubr.msk.f32.vlgmr.msra.gmra.mrb[12].mxu1 %vm325_vm4, %v989_v5 }
 0x383   :  { %4250 = vmatpush1.bf16.msra.mxu1 %v4249_v61  ;;  %4238 = vmatpush1.bf16.msra.mxu0 %v4237_v63  ;;  %v3616_v61 = vld [vmem:[%s6148_s12 + $0xc8] sm:$0xff]  ;;  %v3611_v63 = vld [vmem:[%s6148_s12 + $0xa0] sm:$0xff] }
 0x384   :  { %1146 = vmatprep.mubr.f32.mxu0 %v4746_v3  ;;  %1376 = vmatprep.mubr.f32.mxu1 %v4746_v3  ;;  %v4329_v8 = vpack.c.bf16 %v3619_v4, %v3611_v63  ;;  %v3622_v63 = vld [vmem:[%s6148_s12 + $0xf8] sm:$0xff] }
 0x385   :  { %4252 = vmatprep.subr.bf16.mxu1 %v4251_v13  ;;  %4244 = vmatprep.subr.bf16.mxu0 %v4243_v15  ;;  %v4321_v13 = vpack.c.bf16 %v3615_v11, %v3607_v9  ;;  %v3628_v15 = vld [vmem:[%s6145_s9 + $0x88] sm:$0xff]  ;;  %v3633_v11 = vld [vmem:[%s6145_s9 + $0xb0] sm:$0xff] }
 0x386   :  { %3594 = vmatmul.mubr.msk.f32.vlgmr.msra.gmra.mrb[6].mxu0 %vm325_vm4, %v989_v5  ;;  %3605 = vmatmul.mubr.msk.f32.vlgmr.msra.gmra.mrb[18].mxu1 %vm325_vm4, %v4959_v56 }
 0x387   :  { %4254 = vmatpush1.bf16.msra.mxu1 %v4253_v17  ;;  %4246 = vmatpush1.bf16.msra.mxu0 %v4245_v19  ;;  %v3632_v17 = vld [vmem:[%s6145_s9 + $0xa8] sm:$0xff]  ;;  %v3610_v19 = vld [vmem:[%s6148_s12 + $0x98] sm:$0xff] }
 0x388   :  { %1288 = vmatprep.mubr.f32.mxu0 %v4746_v3  ;;  %1447 = vmatprep.mubr.f32.mxu1 %v4746_v3 }
 0x389   :  { %4256 = vmatprep.subr.bf16.mxu1 %v4973_v0  ;;  %4288 = vmatprep.subr.bf16.mxu0 %v5035_v26 }
 0x38a   :  { %3596 = vmatmul.mubr.msk.f32.vlgmr.msra.gmra.mrb[8].mxu0 %vm325_vm4, %v989_v5  ;;  %3606 = vmatmul.mubr.msk.f32.vlgmr.msra.gmra.mrb[20].mxu1 %vm325_vm4, %v4959_v56  ;;  %v4319_v5 = vpack.c.bf16 %v3616_v61, %v3608_v58  ;;  %v3614_v61 = vld [vmem:[%s6148_s12 + $0xb8] sm:$0xff] }
 0x38b   :  { %4258 = vmatpush3.bf16.msra.mxu1 %v5001_v12  ;;  %4290 = vmatpush3.bf16.msra.mxu0 %v5069_v38 }
 0x38c   :  { %4260 = vmatprep.subr.bf16.mxu1 %v5008_v14  ;;  %4292 = vmatprep.subr.bf16.mxu0 %v5075_v40 }
 0x38f   :  { %4262 = vmatpush3.bf16.msra.mxu1 %v5033_v23  ;;  %4294 = vmatpush3.bf16.msra.mxu0 %v5095_v46 }
 0x390   :  { %4264 = vmatprep.subr.bf16.mxu1 %v5047_v30  ;;  %4296 = vmatprep.subr.bf16.mxu0 %v5124_v55 }
 0x393   :  { %4266 = vmatpush3.bf16.msra.mxu1 %v5073_v39  ;;  %4298 = vmatpush3.bf16.msra.mxu0 %v5135_v60 }
 0x394   :  { %4268 = vmatprep.subr.bf16.mxu1 %v5084_v43  ;;  %4300 = vmatprep.subr.bf16.mxu0 %v5160_v6 }
 0x397   :  { %4270 = vmatpush3.bf16.msra.mxu1 %v5099_v47  ;;  %4302 = vmatpush3.bf16.msra.mxu0 %v5171_v10 }
 0x398   :  { %4272 = vmatprep.subr.bf16.mxu1 %v5113_v51  ;;  %4304 = vmatprep.subr.bf16.mxu0 %v5196_v20 }
 0x39b   :  { %4274 = vmatpush3.bf16.msra.mxu1 %v5126_v57  ;;  %4306 = vmatpush3.bf16.msra.mxu0 %v5207_v28 }
 0x39c   :  { %4276 = vmatprep.subr.bf16.mxu1 %v5149_v1  ;;  %4308 = vmatprep.subr.bf16.mxu0 %v5232_v37 }
 0x39f   :  { %4278 = vmatpush3.bf16.msra.mxu1 %v5162_v7  ;;  %4310 = vmatpush3.bf16.msra.mxu0 %v5243_v45 }
 0x3a0   :  { %4280 = vmatprep.subr.bf16.mxu1 %v5185_v16  ;;  %4312 = vmatprep.subr.bf16.mxu0 %v5254_v50 }
 0x3a3   :  { %4282 = vmatpush3.bf16.msra.mxu1 %v5198_v21  ;;  %4314 = vmatpush3.bf16.msra.mxu0 %v5262_v54 }
 0x3a4   :  { %4284 = vmatprep.subr.bf16.mxu1 %v5221_v33  ;;  %4316 = vmatprep.subr.bf16.mxu0 %v5274_v62 }
 0x3a7   :  { %4286 = vmatpush3.bf16.msra.mxu1 %v5234_v41  ;;  %4318 = vmatpush3.bf16.msra.mxu0 %v5280_v2 }
 0x3a8   :  { %4328 = vmatprep.subr.bf16.mxu1 %v4327_v59  ;;  %4320 = vmatprep.subr.bf16.mxu0 %v4319_v5  ;;  %v3634_v59 = vld [vmem:[%s6145_s9 + $0xb8] sm:$0xff] }
 0x459   :  { %v1378_v25 = vpop.f32.mrb[18].mxu1 }
 0x45a   :  { %v1454_v27 = vadd.f32 %v1378_v25, %v5287_v18  ;;  %v1380_v29 = vpop.f32.mrb[19].mxu1  ;;  %v4335_v25 = vpack.c.bf16 %v3632_v17, %v3628_v15  ;;  %v3621_v15 = vld [vmem:[%s6148_s12 + $0xf0] sm:$0xff]  ;;  %v4339_v17 = vpack.c.bf16 %v3634_v59, %v3630_v52  ;;  %v3650_v59 = vld [vmem:[%s6148_s12 + $0x168] sm:$0xff] }
 0x45b   :  { %v1455_v31 = vadd.f32 %v1380_v29, %v5287_v18 }
 0x45d   :  { %4698 = vtanh.f32 %v1455_v31  ;;  %v1449_v24 = vpop.f32.mrb[20].mxu1 }
 0x45e   :  { %4700 = vtanh.f32 %v1454_v27  ;;  %v1456_v34 = vadd.f32 %v1449_v24, %v5287_v18  ;;  %v1451_v35 = vpop.f32.mrb[21].mxu1  ;;  %v3618_v27 = vld [vmem:[%s6148_s12 + $0xd8] sm:$0xff] }
 0x45f   :  { %v1457_v36 = vadd.f32 %v1451_v35, %v5287_v18  ;;  %v4323_v29 = vpack.c.bf16 %v3618_v27, %v3610_v19  ;;  %v3627_v35 = vld [vmem:[%s6145_s9 + $0x80] sm:$0xff]  ;;  %v4331_v19 = vpack.c.bf16 %v3622_v63, %v3614_v61  ;;  %v3638_v61 = vld [vmem:[%s6148_s12 + $0x108] sm:$0xff] }
 0x461   :  { %4702 = vtanh.f32 %v1457_v36 }
 0x462   :  { %4704 = vtanh.f32 %v1456_v34 }
 0x467   :  { %v4699_v42 = vpop.eup %4698 }
 0x468   :  { %v4701_v44 = vpop.eup %4700  ;;  %1526 = vmatprep.mubr.f32.mxu1 %v4699_v42  ;;  %v3631_v42 = vld [vmem:[%s6145_s9 + $0xa0] sm:$0xff] }
 0x469   :  { %1527 = vmatmul.mubr.f32.vlgmr.msra.gmra.mrb[22].mxu1 %v4701_v44  ;;  %v3609_v44 = vld [vmem:[%s6148_s12 + $0x90] sm:$0xff]  ;;  %v4337_v4 = vpack.c.bf16 %v3631_v42, %v3627_v35 }
 0x46a   :  { %1828 = vmatprep.mubr.f32.mxu1 %v4746_v3  ;;  %4330 = vmatpush1.bf16.msra.mxu1 %v4329_v8  ;;  %v3629_v8 = vld [vmem:[%s6145_s9 + $0x90] sm:$0xff] }
 0x46b   :  { %v4703_v48 = vpop.eup %4702  ;;  %4336 = vmatprep.subr.bf16.mxu1 %v4335_v25  ;;  %v4341_v25 = vpack.c.bf16 %v3633_v11, %v3629_v8  ;;  %v3649_v8 = vld [vmem:[%s6148_s12 + $0x160] sm:$0xff] }
 0x46c   :  { %v4705_v49 = vpop.eup %4704  ;;  %1596 = vmatprep.mubr.f32.mxu0 %v4703_v48  ;;  %v3617_v48 = vld [vmem:[%s6148_s12 + $0xd0] sm:$0xff] }
 0x46d   :  { %1597 = vmatmul.mubr.f32.vlgmr.msra.gmra.mrb[14].mxu0 %v4705_v49  ;;  %v4325_v5 = vpack.c.bf16 %v3617_v48, %v3609_v44 }
 0x46e   :  { %1686 = vmatprep.mubr.f32.mxu0 %v4746_v3  ;;  %4322 = vmatpush1.bf16.msra.mxu0 %v4321_v13  ;;  %v3613_v13 = vld [vmem:[%s6148_s12 + $0xb0] sm:$0xff] }
 0x46f   :  { %4324 = vmatprep.subr.bf16.mxu0 %v4323_v29  ;;  %v4333_v27 = vpack.c.bf16 %v3621_v15, %v3613_v13  ;;  %v3637_v13 = vld [vmem:[%s6148_s12 + $0x100] sm:$0xff] }
 0x470   :  { %v3645_v15 = vld [vmem:[%s6148_s12 + $0x140] sm:$0xff] }
 0x53c   :  { %v3799_v31 = vpop.f32.mrb[22].mxu1 }
 0x53d   :  { %v3800_v24 = vpop.f32.mrb[23].mxu1 }
 0x53e   :  { %v3801_v34 = vadd.f32 %v3800_v24, %v3799_v31 }
 0x540   :  { %v3834_v36 = vpop.f32.mrb[14].mxu0  ;;  %v1529_v53 = vadd.f32 %v3801_v34, %v5331_v32 }
 0x541   :  { %v3835_v49 = vpop.f32.mrb[15].mxu0 }
 0x542   :  { %v3836_v58 = vadd.f32 %v3835_v49, %v3834_v36 }
 0x544   :  { %v1599_v9 = vadd.f32 %v3836_v58, %v1529_v53  ;;  %v3642_v58 = vld [vmem:[%s6148_s12 + $0x128] sm:$0xff] }
 0x545   :  { %v4415_v63 = vpack.c.bf16 %v3650_v59, %v3642_v58  ;;  %v3660_v58 = vld [vmem:[%s6145_s9 + $0xd8] sm:$0xff] }
 0x546   :  { %3623 = vmatmul.mubr.msk.f32.vlgmr.msra.gmra.mrb[4].mxu0 %vm325_vm4, %v1599_v9  ;;  %3625 = vmatmul.mubr.msk.f32.vlgmr.msra.gmra.mrb[12].mxu1 %vm325_vm4, %v1599_v9 }
 0x547   :  { %4338 = vmatpush1.bf16.msra.mxu1 %v4337_v4  ;;  %4326 = vmatpush1.bf16.msra.mxu0 %v4325_v5  ;;  %v3646_v4 = vld [vmem:[%s6148_s12 + $0x148] sm:$0xff]  ;;  %v3641_v5 = vld [vmem:[%s6148_s12 + $0x120] sm:$0xff] }
 0x548   :  { %1757 = vmatprep.mubr.f32.mxu0 %v4746_v3  ;;  %1987 = vmatprep.mubr.f32.mxu1 %v4746_v3  ;;  %v4417_v11 = vpack.c.bf16 %v3649_v8, %v3641_v5  ;;  %v3652_v5 = vld [vmem:[%s6148_s12 + $0x178] sm:$0xff] }
 0x549   :  { %4340 = vmatprep.subr.bf16.mxu1 %v4339_v17  ;;  %4332 = vmatprep.subr.bf16.mxu0 %v4331_v19  ;;  %v4409_v17 = vpack.c.bf16 %v3645_v15, %v3637_v13  ;;  %v3658_v19 = vld [vmem:[%s6145_s9 + $0xc8] sm:$0xff]  ;;  %v3663_v15 = vld [vmem:[%s6145_s9 + $0xf0] sm:$0xff] }
 0x54a   :  { %3624 = vmatmul.mubr.msk.f32.vlgmr.msra.gmra.mrb[6].mxu0 %vm325_vm4, %v1599_v9  ;;  %3635 = vmatmul.mubr.msk.f32.vlgmr.msra.gmra.mrb[24].mxu1 %vm325_vm4, %v4959_v56 }
 0x54b   :  { %4342 = vmatpush1.bf16.msra.mxu1 %v4341_v25  ;;  %4334 = vmatpush1.bf16.msra.mxu0 %v4333_v27  ;;  %v3662_v25 = vld [vmem:[%s6145_s9 + $0xe8] sm:$0xff]  ;;  %v3640_v27 = vld [vmem:[%s6148_s12 + $0x118] sm:$0xff] }
 0x54c   :  { %1899 = vmatprep.mubr.f32.mxu0 %v4746_v3  ;;  %2058 = vmatprep.mubr.f32.mxu1 %v4746_v3 }
 0x54d   :  { %4344 = vmatprep.subr.bf16.mxu1 %v4973_v0  ;;  %4376 = vmatprep.subr.bf16.mxu0 %v5035_v26 }
 0x54e   :  { %3626 = vmatmul.mubr.msk.f32.vlgmr.msra.gmra.mrb[8].mxu0 %vm325_vm4, %v1599_v9  ;;  %3636 = vmatmul.mubr.msk.f32.vlgmr.msra.gmra.mrb[26].mxu1 %vm325_vm4, %v4959_v56  ;;  %v4407_v9 = vpack.c.bf16 %v3646_v4, %v3638_v61  ;;  %v3644_v4 = vld [vmem:[%s6148_s12 + $0x138] sm:$0xff] }
 0x54f   :  { %4346 = vmatpush3.bf16.msra.mxu1 %v5001_v12  ;;  %4378 = vmatpush3.bf16.msra.mxu0 %v5069_v38 }
 0x550   :  { %4348 = vmatprep.subr.bf16.mxu1 %v5008_v14  ;;  %4380 = vmatprep.subr.bf16.mxu0 %v5075_v40 }
 0x553   :  { %4350 = vmatpush3.bf16.msra.mxu1 %v5033_v23  ;;  %4382 = vmatpush3.bf16.msra.mxu0 %v5095_v46 }
 0x554   :  { %4352 = vmatprep.subr.bf16.mxu1 %v5047_v30  ;;  %4384 = vmatprep.subr.bf16.mxu0 %v5124_v55 }
 0x557   :  { %4354 = vmatpush3.bf16.msra.mxu1 %v5073_v39  ;;  %4386 = vmatpush3.bf16.msra.mxu0 %v5135_v60 }
 0x558   :  { %4356 = vmatprep.subr.bf16.mxu1 %v5084_v43  ;;  %4388 = vmatprep.subr.bf16.mxu0 %v5160_v6 }
 0x55b   :  { %4358 = vmatpush3.bf16.msra.mxu1 %v5099_v47  ;;  %4390 = vmatpush3.bf16.msra.mxu0 %v5171_v10 }
 0x55c   :  { %4360 = vmatprep.subr.bf16.mxu1 %v5113_v51  ;;  %4392 = vmatprep.subr.bf16.mxu0 %v5196_v20 }
 0x55f   :  { %4362 = vmatpush3.bf16.msra.mxu1 %v5126_v57  ;;  %4394 = vmatpush3.bf16.msra.mxu0 %v5207_v28 }
 0x560   :  { %4364 = vmatprep.subr.bf16.mxu1 %v5149_v1  ;;  %4396 = vmatprep.subr.bf16.mxu0 %v5232_v37 }
 0x563   :  { %4366 = vmatpush3.bf16.msra.mxu1 %v5162_v7  ;;  %4398 = vmatpush3.bf16.msra.mxu0 %v5243_v45 }
 0x564   :  { %4368 = vmatprep.subr.bf16.mxu1 %v5185_v16  ;;  %4400 = vmatprep.subr.bf16.mxu0 %v5254_v50 }
 0x567   :  { %4370 = vmatpush3.bf16.msra.mxu1 %v5198_v21  ;;  %4402 = vmatpush3.bf16.msra.mxu0 %v5262_v54 }
 0x568   :  { %4372 = vmatprep.subr.bf16.mxu1 %v5221_v33  ;;  %4404 = vmatprep.subr.bf16.mxu0 %v5274_v62 }
 0x56b   :  { %4374 = vmatpush3.bf16.msra.mxu1 %v5234_v41  ;;  %4406 = vmatpush3.bf16.msra.mxu0 %v5280_v2 }
 0x56c   :  { %4416 = vmatprep.subr.bf16.mxu1 %v4415_v63  ;;  %4408 = vmatprep.subr.bf16.mxu0 %v4407_v9  ;;  %v3664_v63 = vld [vmem:[%s6145_s9 + $0xf8] sm:$0xff] }
 0x61d   :  { %v1989_v29 = vpop.f32.mrb[24].mxu1 }
 0x61e   :  { %v2065_v31 = vadd.f32 %v1989_v29, %v5287_v18  ;;  %v1991_v24 = vpop.f32.mrb[25].mxu1  ;;  %v4423_v29 = vpack.c.bf16 %v3662_v25, %v3658_v19  ;;  %v3651_v19 = vld [vmem:[%s6148_s12 + $0x170] sm:$0xff]  ;;  %v4427_v25 = vpack.c.bf16 %v3664_v63, %v3660_v58  ;;  %v3163_v58 = vld [vmem:[%s6149_s13 + $0x98] sm:$0xff] }
 0x61f   :  { %v2066_v34 = vadd.f32 %v1991_v24, %v5287_v18 }
 0x621   :  { %4706 = vtanh.f32 %v2066_v34  ;;  %v2060_v35 = vpop.f32.mrb[26].mxu1 }
 0x622   :  { %4708 = vtanh.f32 %v2065_v31  ;;  %v2067_v36 = vadd.f32 %v2060_v35, %v5287_v18  ;;  %v2062_v42 = vpop.f32.mrb[27].mxu1  ;;  %v3648_v31 = vld [vmem:[%s6148_s12 + $0x158] sm:$0xff] }
 0x623   :  { %v2068_v44 = vadd.f32 %v2062_v42, %v5287_v18  ;;  %v4411_v24 = vpack.c.bf16 %v3648_v31, %v3640_v27  ;;  %v3657_v42 = vld [vmem:[%s6145_s9 + $0xc0] sm:$0xff]  ;;  %v4419_v27 = vpack.c.bf16 %v3652_v5, %v3644_v4  ;;  %v3673_v4 = vld [vmem:[%s6148_s12 + $0x1b0] sm:$0xff] }
 0x625   :  { %4710 = vtanh.f32 %v2068_v44 }
 0x626   :  { %4712 = vtanh.f32 %v2067_v36 }
 0x62b   :  { %v4707_v48 = vpop.eup %4706 }
 0x62c   :  { %v4709_v49 = vpop.eup %4708  ;;  %2137 = vmatprep.mubr.f32.mxu1 %v4707_v48  ;;  %v3661_v48 = vld [vmem:[%s6145_s9 + $0xe0] sm:$0xff] }
 0x62d   :  { %2138 = vmatmul.mubr.f32.vlgmr.msra.gmra.mrb[28].mxu1 %v4709_v49  ;;  %v3639_v49 = vld [vmem:[%s6148_s12 + $0x110] sm:$0xff]  ;;  %v4425_v8 = vpack.c.bf16 %v3661_v48, %v3657_v42  ;;  %v3682_v42 = vld [vmem:[%s6148_s12 + $0x1f8] sm:$0xff]  ;;  %v3145_v48 = vld [vmem:[%s6149_s13 + $0x8] sm:$0xff] }
 0x62e   :  { %2439 = vmatprep.mubr.f32.mxu1 %v4746_v3  ;;  %4418 = vmatpush1.bf16.msra.mxu1 %v4417_v11  ;;  %v3659_v11 = vld [vmem:[%s6145_s9 + $0xd0] sm:$0xff] }
 0x62f   :  { %v4711_v52 = vpop.eup %4710  ;;  %4424 = vmatprep.subr.bf16.mxu1 %v4423_v29  ;;  %v4429_v29 = vpack.c.bf16 %v3663_v15, %v3659_v11  ;;  %v3193_v11 = vld [vmem:[%s6149_s13 + $0x188] sm:$0xff]  ;;  %v3147_v15 = vld [vmem:[%s6149_s13 + $0x18] sm:$0xff] }
 0x630   :  { %v4713_v53 = vpop.eup %4712  ;;  %2207 = vmatprep.mubr.f32.mxu0 %v4711_v52  ;;  %v3647_v52 = vld [vmem:[%s6148_s12 + $0x150] sm:$0xff] }
 0x631   :  { %2208 = vmatmul.mubr.f32.vlgmr.msra.gmra.mrb[16].mxu0 %v4713_v53  ;;  %v4413_v9 = vpack.c.bf16 %v3647_v52, %v3639_v49 }
 0x632   :  { %2297 = vmatprep.mubr.f32.mxu0 %v4746_v3  ;;  %4410 = vmatpush1.bf16.msra.mxu0 %v4409_v17  ;;  %v3643_v17 = vld [vmem:[%s6148_s12 + $0x130] sm:$0xff] }
 0x633   :  { %4412 = vmatprep.subr.bf16.mxu0 %v4411_v24  ;;  %v4421_v31 = vpack.c.bf16 %v3651_v19, %v3643_v17  ;;  %v3669_v24 = vld [vmem:[%s6148_s12 + $0x190] sm:$0xff]  ;;  %v3164_v17 = vld [vmem:[%s6149_s13 + $0xa0] sm:$0xff]  ;;  %v3165_v19 = vld [vmem:[%s6149_s13 + $0xa8] sm:$0xff] }
 0x700   :  { %v3869_v34 = vpop.f32.mrb[28].mxu1 }
 0x701   :  { %v3870_v35 = vpop.f32.mrb[29].mxu1 }
 0x702   :  { %v3871_v36 = vadd.f32 %v3870_v35, %v3869_v34  ;;  %v3677_v34 = vld [vmem:[%s6148_s12 + $0x1d0] sm:$0xff]  ;;  %v3674_v35 = vld [vmem:[%s6148_s12 + $0x1b8] sm:$0xff] }
 0x703   :  { %v4507_v63 = vpack.c.bf16 %v3682_v42, %v3674_v35  ;;  %v3200_v35 = vld [vmem:[%s6149_s13 + $0x1c0] sm:$0xff]  ;;  %v3201_v42 = vld [vmem:[%s6149_s13 + $0x1c8] sm:$0xff] }
 0x704   :  { %v3904_v44 = vpop.f32.mrb[16].mxu0  ;;  %v2140_v59 = vadd.f32 %v3871_v36, %v5331_v32 }
 0x705   :  { %v3905_v53 = vpop.f32.mrb[17].mxu0 }
 0x706   :  { %v3906_v61 = vadd.f32 %v3905_v53, %v3904_v44  ;;  %v3144_v44 = vld [vmem:[%s6149_s13] sm:$0xff]  ;;  %v3162_v53 = vld [vmem:[%s6149_s13 + $0x90] sm:$0xff] }
 0x707   :  { %v4513_v5 = vpack.c.bf16 %v3145_v48, %v3144_v44  ;;  %v3154_v44 = vld [vmem:[%s6149_s13 + $0x50] sm:$0xff]  ;;  %v3155_v48 = vld [vmem:[%s6149_s13 + $0x58] sm:$0xff] }
 0x708   :  { %v2210_v13 = vadd.f32 %v3906_v61, %v2140_v59  ;;  %v4501_v59 = vpack.c.bf16 %v3677_v34, %v3669_v24  ;;  %v3182_v24 = vld [vmem:[%s6149_s13 + $0x130] sm:$0xff]  ;;  %v3183_v34 = vld [vmem:[%s6149_s13 + $0x138] sm:$0xff] }
 0x70a   :  { %3653 = vmatmul.mubr.msk.f32.vlgmr.msra.gmra.mrb[4].mxu0 %vm325_vm4, %v2210_v13  ;;  %3655 = vmatmul.mubr.msk.f32.vlgmr.msra.gmra.mrb[12].mxu1 %vm325_vm4, %v2210_v13 }
 0x70b   :  { %4426 = vmatpush1.bf16.msra.mxu1 %v4425_v8  ;;  %4414 = vmatpush1.bf16.msra.mxu0 %v4413_v9  ;;  %v3192_v8 = vld [vmem:[%s6149_s13 + $0x180] sm:$0xff]  ;;  %v4515_v9 = vpack.c.bf16 %v3163_v58, %v3162_v53  ;;  %v4557_v53 = vpack.c.bf16 %v3183_v34, %v3182_v24  ;;  %v4559_v58 = vpack.c.bf16 %v3201_v42, %v3200_v35  ;;  %v3210_v34 = vld [vmem:[%s6149_s13 + $0x210] sm:$0xff]  ;;  %v3211_v35 = vld [vmem:[%s6149_s13 + $0x218] sm:$0xff] }
 0x70c   :  { %2368 = vmatprep.mubr.f32.mxu0 %v4746_v3  ;;  %2598 = vmatprep.mubr.f32.mxu1 %v4746_v3 }
 0x70d   :  { %4428 = vmatprep.subr.bf16.mxu1 %v4427_v25  ;;  %4420 = vmatprep.subr.bf16.mxu0 %v4419_v27  ;;  %v4543_v27 = vpack.c.bf16 %v3193_v11, %v3192_v8  ;;  %v3156_v8 = vld [vmem:[%s6149_s13 + $0x60] sm:$0xff] }
 0x70e   :  { %3654 = vmatmul.mubr.msk.f32.vlgmr.msra.gmra.mrb[6].mxu0 %vm325_vm4, %v2210_v13  ;;  %3665 = vmatmul.mubr.msk.f32.vlgmr.msra.gmra.mrb[30].mxu1 %vm325_vm4, %v4959_v56 }
 0x70f   :  { %4430 = vmatpush1.bf16.msra.mxu1 %v4429_v29  ;;  %4422 = vmatpush1.bf16.msra.mxu0 %v4421_v31  ;;  %v3176_v31 = vld [vmem:[%s6149_s13 + $0x100] sm:$0xff] }
 0x710   :  { %2510 = vmatprep.mubr.f32.mxu0 %v4746_v3  ;;  %2669 = vmatprep.mubr.f32.mxu1 %v4746_v3 }
 0x711   :  { %4432 = vmatprep.subr.bf16.mxu1 %v4973_v0  ;;  %4464 = vmatprep.subr.bf16.mxu0 %v5035_v26 }
 0x712   :  { %3656 = vmatmul.mubr.msk.f32.vlgmr.msra.gmra.mrb[8].mxu0 %vm325_vm4, %v2210_v13  ;;  %3666 = vmatmul.mubr.msk.f32.vlgmr.msra.gmra.mrb[32].mxu1 %vm325_vm4, %v4959_v56  ;;  %v3146_v13 = vld [vmem:[%s6149_s13 + $0x10] sm:$0xff] }
 0x713   :  { %4434 = vmatpush3.bf16.msra.mxu1 %v5001_v12  ;;  %4466 = vmatpush3.bf16.msra.mxu0 %v5069_v38  ;;  %v4517_v29 = vpack.c.bf16 %v3147_v15, %v3146_v13 }
 0x714   :  { %4436 = vmatprep.subr.bf16.mxu1 %v5008_v14  ;;  %4468 = vmatprep.subr.bf16.mxu0 %v5075_v40 }
 0x717   :  { %4438 = vmatpush3.bf16.msra.mxu1 %v5033_v23  ;;  %4470 = vmatpush3.bf16.msra.mxu0 %v5095_v46 }
 0x718   :  { %4440 = vmatprep.subr.bf16.mxu1 %v5047_v30  ;;  %4472 = vmatprep.subr.bf16.mxu0 %v5124_v55  ;;  %v3672_v55 = vld [vmem:[%s6148_s12 + $0x1a8] sm:$0xff] }
 0x71b   :  { %4442 = vmatpush3.bf16.msra.mxu1 %v5073_v39  ;;  %4474 = vmatpush3.bf16.msra.mxu0 %v5135_v60  ;;  %v3667_v60 = vld [vmem:[%s6148_s12 + $0x180] sm:$0xff] }
 0x71c   :  { %4444 = vmatprep.subr.bf16.mxu1 %v5084_v43  ;;  %4476 = vmatprep.subr.bf16.mxu0 %v5160_v6  ;;  %v3680_v6 = vld [vmem:[%s6148_s12 + $0x1e8] sm:$0xff] }
 0x71f   :  { %4446 = vmatpush3.bf16.msra.mxu1 %v5099_v47  ;;  %4478 = vmatpush3.bf16.msra.mxu0 %v5171_v10  ;;  %v3668_v47 = vld [vmem:[%s6148_s12 + $0x188] sm:$0xff]  ;;  %v4503_v10 = vpack.c.bf16 %v3680_v6, %v3672_v55 }
 0x720   :  { %4448 = vmatprep.subr.bf16.mxu1 %v5113_v51  ;;  %4480 = vmatprep.subr.bf16.mxu0 %v5196_v20  ;;  %v3676_v51 = vld [vmem:[%s6148_s12 + $0x1c8] sm:$0xff]  ;;  %v3679_v20 = vld [vmem:[%s6148_s12 + $0x1e0] sm:$0xff] }
 0x721   :  { %v3169_v6 = vld [vmem:[%s6149_s13 + $0xc8] sm:$0xff] }
 0x723   :  { %4450 = vmatpush3.bf16.msra.mxu1 %v5126_v57  ;;  %4482 = vmatpush3.bf16.msra.mxu0 %v5207_v28  ;;  %v4495_v57 = vpack.c.bf16 %v3676_v51, %v3668_v47  ;;  %v3670_v28 = vld [vmem:[%s6148_s12 + $0x198] sm:$0xff]  ;;  %v3196_v51 = vld [vmem:[%s6149_s13 + $0x1a0] sm:$0xff] }
 0x724   :  { %4452 = vmatprep.subr.bf16.mxu1 %v5149_v1  ;;  %4484 = vmatprep.subr.bf16.mxu0 %v5232_v37  ;;  %v3675_v1 = vld [vmem:[%s6148_s12 + $0x1c0] sm:$0xff]  ;;  %v3179_v47 = vld [vmem:[%s6149_s13 + $0x118] sm:$0xff] }
 0x727   :  { %4454 = vmatpush3.bf16.msra.mxu1 %v5162_v7  ;;  %4486 = vmatpush3.bf16.msra.mxu0 %v5243_v45  ;;  %v4497_v7 = vpack.c.bf16 %v3675_v1, %v3667_v60  ;;  %v3161_v45 = vld [vmem:[%s6149_s13 + $0x88] sm:$0xff]  ;;  %v3151_v60 = vld [vmem:[%s6149_s13 + $0x38] sm:$0xff]  ;;  %v3168_v1 = vld [vmem:[%s6149_s13 + $0xc0] sm:$0xff] }
 0x728   :  { %4456 = vmatprep.subr.bf16.mxu1 %v5185_v16  ;;  %4488 = vmatprep.subr.bf16.mxu0 %v5254_v50  ;;  %v3671_v16 = vld [vmem:[%s6148_s12 + $0x1a0] sm:$0xff] }
 0x72b   :  { %4458 = vmatpush3.bf16.msra.mxu1 %v5198_v21  ;;  %4490 = vmatpush3.bf16.msra.mxu0 %v5262_v54  ;;  %v4505_v21 = vpack.c.bf16 %v3679_v20, %v3671_v16  ;;  %v3180_v20 = vld [vmem:[%s6149_s13 + $0x120] sm:$0xff] }
 0x72c   :  { %4460 = vmatprep.subr.bf16.mxu1 %v5221_v33  ;;  %4492 = vmatprep.subr.bf16.mxu0 %v5274_v62  ;;  %v3678_v33 = vld [vmem:[%s6148_s12 + $0x1d8] sm:$0xff] }
 0x72d   :  { %v4499_v37 = vpack.c.bf16 %v3678_v33, %v3670_v28  ;;  %v3198_v28 = vld [vmem:[%s6149_s13 + $0x1b0] sm:$0xff]  ;;  %v4527_v33 = vpack.c.bf16 %v3169_v6, %v3168_v1  ;;  %v3256_v1 = vld [vmem:[%s6149_s13 + $0x380] sm:$0xff]  ;;  %v3257_v6 = vld [vmem:[%s6149_s13 + $0x388] sm:$0xff] }
 0x72f   :  { %4462 = vmatpush3.bf16.msra.mxu1 %v5234_v41  ;;  %4494 = vmatpush3.bf16.msra.mxu0 %v5280_v2  ;;  %v3160_v41 = vld [vmem:[%s6149_s13 + $0x80] sm:$0xff] }
 0x730   :  { %4496 = vmatprep.subr.bf16.mxu0 %v4495_v57  ;;  %4504 = vmatprep.subr.bf16.mxu1 %v4503_v10  ;;  %v4511_v50 = vpack.c.bf16 %v3161_v45, %v3160_v41  ;;  %v3150_v57 = vld [vmem:[%s6149_s13 + $0x30] sm:$0xff]  ;;  %v3152_v41 = vld [vmem:[%s6149_s13 + $0x40] sm:$0xff]  ;;  %v3153_v45 = vld [vmem:[%s6149_s13 + $0x48] sm:$0xff] }
 0x731   :  { %v4525_v16 = vpack.c.bf16 %v3151_v60, %v3150_v57 }
 0x7e1   :  { %v2600_v56 = vpop.f32.mrb[30].mxu1 }
 0x7e2   :  { %v2676_v0 = vadd.f32 %v2600_v56, %v5287_v18  ;;  %v2602_v12 = vpop.f32.mrb[31].mxu1  ;;  %v3177_v56 = vld [vmem:[%s6149_s13 + $0x108] sm:$0xff] }
 0x7e3   :  { %v2677_v14 = vadd.f32 %v2602_v12, %v5287_v18  ;;  %v4519_v12 = vpack.c.bf16 %v3165_v19, %v3164_v17  ;;  %v3186_v17 = vld [vmem:[%s6149_s13 + $0x150] sm:$0xff]  ;;  %v3187_v19 = vld [vmem:[%s6149_s13 + $0x158] sm:$0xff] }
 0x7e5   :  { %4714 = vtanh.f32 %v2677_v14  ;;  %v2671_v23 = vpop.f32.mrb[32].mxu1  ;;  %v3195_v14 = vld [vmem:[%s6149_s13 + $0x198] sm:$0xff] }
 0x7e6   :  { %4716 = vtanh.f32 %v2676_v0  ;;  %v2678_v26 = vadd.f32 %v2671_v23, %v5287_v18  ;;  %v2673_v30 = vpop.f32.mrb[33].mxu1  ;;  %v3194_v0 = vld [vmem:[%s6149_s13 + $0x190] sm:$0xff]  ;;  %v3148_v23 = vld [vmem:[%s6149_s13 + $0x20] sm:$0xff] }
 0x7e7   :  { %v2679_v38 = vadd.f32 %v2673_v30, %v5287_v18  ;;  %v3166_v30 = vld [vmem:[%s6149_s13 + $0xb0] sm:$0xff] }
 0x7e9   :  { %4718 = vtanh.f32 %v2679_v38  ;;  %v3167_v38 = vld [vmem:[%s6149_s13 + $0xb8] sm:$0xff] }
 0x7ea   :  { %4720 = vtanh.f32 %v2678_v26  ;;  %v3149_v26 = vld [vmem:[%s6149_s13 + $0x28] sm:$0xff]  ;;  %v4523_v55 = vpack.c.bf16 %v3167_v38, %v3166_v30  ;;  %v3188_v30 = vld [vmem:[%s6149_s13 + $0x160] sm:$0xff] }
 0x7eb   :  { %v3189_v38 = vld [vmem:[%s6149_s13 + $0x168] sm:$0xff] }
 0x7ef   :  { %v4715_v39 = vpop.eup %4714 }
 0x7f0   :  { %v4717_v40 = vpop.eup %4716  ;;  %2748 = vmatprep.mubr.f32.mxu1 %v4715_v39  ;;  %v4545_v39 = vpack.c.bf16 %v3177_v56, %v3176_v31  ;;  %v3204_v31 = vld [vmem:[%s6149_s13 + $0x1e0] sm:$0xff] }
 0x7f1   :  { %2749 = vmatmul.mubr.f32.vlgmr.msra.gmra.mrb[34].mxu1 %v4717_v40  ;;  %v4547_v40 = vpack.c.bf16 %v3195_v14, %v3194_v0  ;;  %v3205_v0 = vld [vmem:[%s6149_s13 + $0x1e8] sm:$0xff]  ;;  %v3159_v14 = vld [vmem:[%s6149_s13 + $0x78] sm:$0xff] }
 0x7f2   :  { %3050 = vmatprep.mubr.f32.mxu1 %v4746_v3  ;;  %4506 = vmatpush1.bf16.msra.mxu1 %v4505_v21  ;;  %v3181_v21 = vld [vmem:[%s6149_s13 + $0x128] sm:$0xff] }
 0x7f3   :  { %v4719_v43 = vpop.eup %4718  ;;  %4512 = vmatprep.subr.bf16.mxu1 %v4511_v50  ;;  %v3170_v50 = vld [vmem:[%s6149_s13 + $0xd0] sm:$0xff] }
 0x7f4   :  { %v4721_v46 = vpop.eup %4720  ;;  %2818 = vmatprep.mubr.f32.mxu0 %v4719_v43  ;;  %v4521_v43 = vpack.c.bf16 %v3149_v26, %v3148_v23  ;;  %v4567_v23 = vpack.c.bf16 %v3205_v0, %v3204_v31  ;;  %v3230_v31 = vld [vmem:[%s6149_s13 + $0x2b0] sm:$0xff]  ;;  %v3231_v0 = vld [vmem:[%s6149_s13 + $0x2b8] sm:$0xff] }
 0x7f5   :  { %2819 = vmatmul.mubr.f32.vlgmr.msra.gmra.mrb[18].mxu0 %v4721_v46  ;;  %v3178_v46 = vld [vmem:[%s6149_s13 + $0x110] sm:$0xff] }
 0x7f6   :  { %2908 = vmatprep.mubr.f32.mxu0 %v4746_v3  ;;  %4498 = vmatpush1.bf16.msra.mxu0 %v4497_v7  ;;  %v4549_v7 = vpack.c.bf16 %v3179_v47, %v3178_v46  ;;  %v3224_v46 = vld [vmem:[%s6149_s13 + $0x280] sm:$0xff] }
 0x7f7   :  { %4500 = vmatprep.subr.bf16.mxu0 %v4499_v37  ;;  %v3199_v37 = vld [vmem:[%s6149_s13 + $0x1b8] sm:$0xff] }
 0x8c4   :  { %v3939_v54 = vpop.f32.mrb[34].mxu1 }
 0x8c5   :  { %v3940_v62 = vpop.f32.mrb[35].mxu1 }
 0x8c6   :  { %v3941_v2 = vadd.f32 %v3940_v62, %v3939_v54  ;;  %v3171_v54 = vld [vmem:[%s6149_s13 + $0xd8] sm:$0xff]  ;;  %v4553_v62 = vpack.c.bf16 %v3181_v21, %v3180_v20 }
 0x8c8   :  { %v3974_v18 = vpop.f32.mrb[18].mxu0  ;;  %v2751_v49 = vadd.f32 %v3941_v2, %v5331_v32  ;;  %v3681_v32 = vld [vmem:[%s6148_s12 + $0x1f0] sm:$0xff]  ;;  %v4555_v2 = vpack.c.bf16 %v3199_v37, %v3198_v28 }
 0x8c9   :  { %v3975_v36 = vpop.f32.mrb[19].mxu0  ;;  %v4509_v25 = vpack.c.bf16 %v3681_v32, %v3673_v4  ;;  %v3202_v4 = vld [vmem:[%s6149_s13 + $0x1d0] sm:$0xff] }
 0x8ca   :  { %v3976_v52 = vadd.f32 %v3975_v36, %v3974_v18  ;;  %v4529_v18 = vpack.c.bf16 %v3153_v45, %v3152_v41  ;;  %v4531_v36 = vpack.c.bf16 %v3171_v54, %v3170_v50  ;;  %v3208_v41 = vld [vmem:[%s6149_s13 + $0x200] sm:$0xff]  ;;  %v3209_v45 = vld [vmem:[%s6149_s13 + $0x208] sm:$0xff]  ;;  %v3226_v54 = vld [vmem:[%s6149_s13 + $0x290] sm:$0xff] }
 0x8cb   :  { %v4577_v24 = vpack.c.bf16 %v3209_v45, %v3208_v41  ;;  %v3235_v41 = vld [vmem:[%s6149_s13 + $0x2d8] sm:$0xff]  ;;  %v3264_v45 = vld [vmem:[%s6149_s13 + $0x3c0] sm:$0xff] }
 0x8cc   :  { %v2821_v61 = vadd.f32 %v3976_v52, %v2751_v49  ;;  %v3172_v49 = vld [vmem:[%s6149_s13 + $0xe0] sm:$0xff]  ;;  %v3173_v52 = vld [vmem:[%s6149_s13 + $0xe8] sm:$0xff] }
 0x8cd   :  { %v4535_v32 = vpack.c.bf16 %v3173_v52, %v3172_v49  ;;  %v3240_v49 = vld [vmem:[%s6149_s13 + $0x300] sm:$0xff]  ;;  %v3241_v52 = vld [vmem:[%s6149_s13 + $0x308] sm:$0xff] }
 0x8ce   :  { %3683 = vmatmul.mubr.msk.f32.vlgmr.msra.gmra.mrb[4].mxu0 %vm325_vm4, %v2821_v61  ;;  %3685 = vmatmul.mubr.msk.f32.vlgmr.msra.gmra.mrb[12].mxu1 %vm325_vm4, %v2821_v61 }
 0x8cf   :  { %4502 = vmatpush1.bf16.msra.mxu0 %v4501_v59  ;;  %2979 = vmatprep.mubr.f32.mxu0 %v4746_v3  ;;  %v4533_v59 = vpack.c.bf16 %v3155_v48, %v3154_v44 }
 0x8d0   :  { %4508 = vmatprep.subr.bf16.mxu0 %v4507_v63  ;;  %4514 = vmatpush3.bf16.msra.mxu1 %v4513_v5  ;;  %v3185_v63 = vld [vmem:[%s6149_s13 + $0x148] sm:$0xff]  ;;  %v3203_v5 = vld [vmem:[%s6149_s13 + $0x1d8] sm:$0xff] }
 0x8d1   :  { %4516 = vmatprep.subr.bf16.mxu1 %v4515_v9  ;;  %v3157_v9 = vld [vmem:[%s6149_s13 + $0x68] sm:$0xff]  ;;  %v4563_v13 = vpack.c.bf16 %v3203_v5, %v3202_v4  ;;  %v3259_v4 = vld [vmem:[%s6149_s13 + $0x398] sm:$0xff] }
 0x8d2   :  { %3684 = vmatmul.mubr.msk.f32.vlgmr.msra.gmra.mrb[6].mxu0 %vm325_vm4, %v2821_v61  ;;  %v4537_v15 = vpack.c.bf16 %v3157_v9, %v3156_v8  ;;  %v4581_v8 = vpack.c.bf16 %v3211_v35, %v3210_v34  ;;  %v4609_v9 = vpack.c.bf16 %v3241_v52, %v3240_v49  ;;  %v3248_v34 = vld [vmem:[%s6149_s13 + $0x340] sm:$0xff]  ;;  %v3249_v35 = vld [vmem:[%s6149_s13 + $0x348] sm:$0xff] }
 0x8d3   :  { %4510 = vmatpush1.bf16.msra.mxu0 %v4509_v25  ;;  %3121 = vmatprep.mubr.f32.mxu0 %v4746_v3  ;;  %v3197_v3 = vld [vmem:[%s6149_s13 + $0x1a8] sm:$0xff]  ;;  %v4565_v25 = vpack.c.bf16 %v3187_v19, %v3186_v17  ;;  %v4625_v52 = vpack.c.bf16 %v3249_v35, %v3248_v34 }
 0x8d4   :  { %4544 = vmatprep.subr.bf16.mxu0 %v4543_v27  ;;  %4518 = vmatpush3.bf16.msra.mxu1 %v4517_v29  ;;  %v4551_v10 = vpack.c.bf16 %v3197_v3, %v3196_v51  ;;  %v3174_v27 = vld [vmem:[%s6149_s13 + $0xf0] sm:$0xff]  ;;  %v3175_v29 = vld [vmem:[%s6149_s13 + $0xf8] sm:$0xff]  ;;  %v3225_v51 = vld [vmem:[%s6149_s13 + $0x288] sm:$0xff] }
 0x8d5   :  { %4520 = vmatprep.subr.bf16.mxu1 %v4519_v12  ;;  %v4539_v56 = vpack.c.bf16 %v3175_v29, %v3174_v27  ;;  %v3158_v12 = vld [vmem:[%s6149_s13 + $0x70] sm:$0xff]  ;;  %v3191_v3 = vld [vmem:[%s6149_s13 + $0x178] sm:$0xff]  ;;  %v4575_v57 = vpack.c.bf16 %v3225_v51, %v3224_v46  ;;  %v3244_v46 = vld [vmem:[%s6149_s13 + $0x320] sm:$0xff] }
 0x8d6   :  { %3686 = vmatmul.mubr.msk.f32.vlgmr.msra.gmra.mrb[8].mxu0 %vm325_vm4, %v2821_v61  ;;  %v3184_v61 = vld [vmem:[%s6149_s13 + $0x140] sm:$0xff]  ;;  %v4541_v26 = vpack.c.bf16 %v3159_v14, %v3158_v12  ;;  %v3242_v27 = vld [vmem:[%s6149_s13 + $0x310] sm:$0xff]  ;;  %v3243_v29 = vld [vmem:[%s6149_s13 + $0x318] sm:$0xff] }
 0x8d7   :  { %4546 = vmatpush3.bf16.msra.mxu0 %v4545_v39  ;;  %v4561_v11 = vpack.c.bf16 %v3185_v63, %v3184_v61  ;;  %v4569_v39 = vpack.c.bf16 %v3189_v38, %v3188_v30  ;;  %v3229_v61 = vld [vmem:[%s6149_s13 + $0x2a8] sm:$0xff]  ;;  %v3258_v63 = vld [vmem:[%s6149_s13 + $0x390] sm:$0xff]  ;;  %v3260_v12 = vld [vmem:[%s6149_s13 + $0x3a0] sm:$0xff]  ;;  %v4613_v30 = vpack.c.bf16 %v3243_v29, %v3242_v27 }
 0x8d8   :  { %4548 = vmatprep.subr.bf16.mxu0 %v4547_v40  ;;  %4522 = vmatpush3.bf16.msra.mxu1 %v4521_v43  ;;  %v3206_v40 = vld [vmem:[%s6149_s13 + $0x1f0] sm:$0xff]  ;;  %v3207_v43 = vld [vmem:[%s6149_s13 + $0x1f8] sm:$0xff]  ;;  %v3261_v14 = vld [vmem:[%s6149_s13 + $0x3a8] sm:$0xff] }
 0x8d9   :  { %4524 = vmatprep.subr.bf16.mxu1 %v4523_v55  ;;  %v4571_v47 = vpack.c.bf16 %v3207_v43, %v3206_v40  ;;  %v3190_v55 = vld [vmem:[%s6149_s13 + $0x170] sm:$0xff]  ;;  %v4587_v40 = vpack.c.bf16 %v3231_v0, %v3230_v31  ;;  %v4615_v43 = vpack.c.bf16 %v3261_v14, %v3260_v12  ;;  %v3232_v51 = vld [vmem:[%s6149_s13 + $0x2c0] sm:$0xff]  ;;  %v3223_v27 = vld [vmem:[%s6149_s13 + $0x278] sm:$0xff] }
 0x8da   :  { %v4573_v60 = vpack.c.bf16 %v3191_v3, %v3190_v55  ;;  %v3214_v38 = vld [vmem:[%s6149_s13 + $0x230] sm:$0xff]  ;;  %v3233_v55 = vld [vmem:[%s6149_s13 + $0x2c8] sm:$0xff]  ;;  %v3252_v29 = vld [vmem:[%s6149_s13 + $0x360] sm:$0xff] }
 0x8db   :  { %4550 = vmatpush3.bf16.msra.mxu0 %v4549_v7  ;;  %v4607_v7 = vpack.c.bf16 %v3257_v6, %v3256_v1  ;;  %v3262_v3 = vld [vmem:[%s6149_s13 + $0x3b0] sm:$0xff]  ;;  %v3216_v6 = vld [vmem:[%s6149_s13 + $0x240] sm:$0xff]  ;;  %v3253_v31 = vld [vmem:[%s6149_s13 + $0x368] sm:$0xff] }
 0x8dc   :  { %4552 = vmatprep.subr.bf16.mxu0 %v4551_v10  ;;  %4526 = vmatpush3.bf16.msra.mxu1 %v4525_v16  ;;  %v304_v10 = vpop.permute.xlu0 %303  ;;  %v3271_v0 = vld [vmem:[%s6149_s13 + $0x3f8] sm:$0xff]  ;;  %v4633_v14 = vpack.c.bf16 %v3253_v31, %v3252_v29 }
 0x8dd   :  { %4528 = vmatprep.subr.bf16.mxu1 %v4527_v33  ;;  %v5927_v16 = vsel %vm298_vm5, %v5030_v22, %v304_v10  ;;  %v4591_v10 = vpack.c.bf16 %v3233_v55, %v3232_v51 }
 0x8df   :  { %4554 = vmatpush3.bf16.msra.mxu0 %v4553_v62  ;;  %v3227_v62 = vld [vmem:[%s6149_s13 + $0x298] sm:$0xff] }
 0x8e0   :  { %4556 = vmatprep.subr.bf16.mxu0 %v4555_v2  ;;  %4530 = vmatpush3.bf16.msra.mxu1 %v4529_v18  ;;  %v4579_v48 = vpack.c.bf16 %v3227_v62, %v3226_v54  ;;  %v3218_v62 = vld [vmem:[%s6149_s13 + $0x250] sm:$0xff] }
 0x8e1   :  { %4532 = vmatprep.subr.bf16.mxu1 %v4531_v36 }
 0x8e3   :  { %4558 = vmatpush3.bf16.msra.mxu0 %v4557_v53  ;;  %v3228_v53 = vld [vmem:[%s6149_s13 + $0x2a0] sm:$0xff] }
 0x8e4   :  { %4560 = vmatprep.subr.bf16.mxu0 %v4559_v58  ;;  %4534 = vmatpush3.bf16.msra.mxu1 %v4533_v59  ;;  %v4583_v19 = vpack.c.bf16 %v3229_v61, %v3228_v53  ;;  %v3220_v53 = vld [vmem:[%s6149_s13 + $0x260] sm:$0xff] }
 0x8e5   :  { %4536 = vmatprep.subr.bf16.mxu1 %v4535_v32 }
 0x8e7   :  { %4562 = vmatpush3.bf16.msra.mxu0 %v4561_v11  ;;  %v3212_v11 = vld [vmem:[%s6149_s13 + $0x220] sm:$0xff] }
 0x8e8   :  { %4564 = vmatprep.subr.bf16.mxu0 %v4563_v13  ;;  %4538 = vmatpush3.bf16.msra.mxu1 %v4537_v15  ;;  %v3213_v13 = vld [vmem:[%s6149_s13 + $0x228] sm:$0xff] }
 0x8e9   :  { %4540 = vmatprep.subr.bf16.mxu1 %v4539_v56 }
 0x8eb   :  { %4566 = vmatpush3.bf16.msra.mxu0 %v4565_v25  ;;  %v4611_v25 = vpack.c.bf16 %v3259_v4, %v3258_v63  ;;  %v3250_v63 = vld [vmem:[%s6149_s13 + $0x350] sm:$0xff]  ;;  %v3251_v4 = vld [vmem:[%s6149_s13 + $0x358] sm:$0xff] }
 0x8ec   :  { %4568 = vmatprep.subr.bf16.mxu0 %v4567_v23  ;;  %4542 = vmatpush3.bf16.msra.mxu1 %v4541_v26  ;;  %v4585_v26 = vpack.c.bf16 %v3213_v13, %v3212_v11  ;;  %v3269_v11 = vld [vmem:[%s6149_s13 + $0x3e8] sm:$0xff] }
 0x8ed   :  { %4576 = vmatprep.subr.bf16.mxu1 %v4575_v57  ;;  %v3263_v57 = vld [vmem:[%s6149_s13 + $0x3b8] sm:$0xff] }
 0x8ef   :  { %4570 = vmatpush3.bf16.msra.mxu0 %v4569_v39  ;;  %v3215_v39 = vld [vmem:[%s6149_s13 + $0x238] sm:$0xff] }
 0x8f0   :  { %4572 = vmatprep.subr.bf16.mxu0 %v4571_v47  ;;  %v3245_v47 = vld [vmem:[%s6149_s13 + $0x328] sm:$0xff] }
 0x8f1   :  { %v4617_v1 = vpack.c.bf16 %v3245_v47, %v3244_v46 }
 0x8f3   :  { %4574 = vmatpush3.bf16.msra.mxu0 %v4573_v60  ;;  %v4589_v60 = vpack.c.bf16 %v3215_v39, %v3214_v38  ;;  %v3255_v38 = vld [vmem:[%s6149_s13 + $0x378] sm:$0xff] }
 0x8f4   :  { %4608 = vmatprep.subr.bf16.mxu0 %v4607_v7  ;;  %v3217_v7 = vld [vmem:[%s6149_s13 + $0x248] sm:$0xff] }
 0x9a1   :  { %v2910_v20 = vpop.f32.mrb[4].mxu0  ;;  %v5929_v21 = vpop.f32.mrb[12].mxu1 }
 0x9a2   :  { %v4639_v28 = vadd.f32 %v2910_v20, %v5927_v16  ;;  %v2912_v33 = vpop.f32.mrb[5].mxu0  ;;  %v3054_v37 = vpop.f32.mrb[13].mxu1  ;;  %v4619_v20 = vpack.c.bf16 %v3263_v57, %v3262_v3 }
 0x9a3   :  { %v4640_v50 = vadd.f32 %v2912_v33, %v5927_v16  ;;  %v4644_v22 = vadd.f32 %v3054_v37, %v5927_v16  ;;  %v3247_v33 = vld [vmem:[%s6149_s13 + $0x338] sm:$0xff]  ;;  %v3234_v37 = vld [vmem:[%s6149_s13 + $0x2d0] sm:$0xff]  ;;  %v3279_v3 = vpop.permute.xlu1 %3278 }
 0x9a4   :  { %v3136_v36 = vmax.f32 %v4639_v28, 0.0  ;;  %v3246_v28 = vld [vmem:[%s6149_s13 + $0x330] sm:$0xff] }
 0x9a5   :  { %v3137_v2 = vmax.f32 %v4640_v50, 0.0  ;;  %v2981_v18 = vpop.f32.mrb[6].mxu0  ;;  %v3141_v58 = vmax.f32 %v4644_v22, 0.0  ;;  %v3265_v50 = vld [vmem:[%s6149_s13 + $0x3c8] sm:$0xff]  ;;  %v4593_v22 = vpack.c.bf16 %v3217_v7, %v3216_v6  ;;  %v4621_v54 = vpack.c.bf16 %v3247_v33, %v3246_v28 }
 0x9a6   :  { %v4641_v42 = vadd.f32 %v2981_v18, %v5927_v16  ;;  %v2983_v44 = vpop.f32.mrb[7].mxu0  ;;  %v4595_v18 = vpack.c.bf16 %v3235_v41, %v3234_v37 }
 0x9a7   :  { %v4642_v59 = vadd.f32 %v2983_v44, %v5927_v16  ;;  %3345 = vmatprep.mubr.f32.mxu1 %v3137_v2  ;;  %v3219_v2 = vld [vmem:[%s6149_s13 + $0x258] sm:$0xff]  ;;  %v3266_v44 = vld [vmem:[%s6149_s13 + $0x3d0] sm:$0xff] }
 0x9a8   :  { %3346 = vmatmul.mubr.f32.vlgmr.msra.gmra.mrb[36].mxu1 %v3136_v36  ;;  %v3138_v15 = vmax.f32 %v4641_v42, 0.0  ;;  %v3236_v36 = vld [vmem:[%s6149_s13 + $0x2e0] sm:$0xff]  ;;  %v3237_v42 = vld [vmem:[%s6149_s13 + $0x2e8] sm:$0xff]  ;;  %v4597_v49 = vpack.c.bf16 %v3219_v2, %v3218_v62 }
 0x9a9   :  { %v3139_v32 = vmax.f32 %v4642_v59, 0.0  ;;  %4578 = vmatpush3.bf16.msra.mxu1 %v4577_v24  ;;  %v5972_v5 = vpop.f32.mrb[8].mxu0  ;;  %3485 = vmatprep.mubr.f32.mxu1 %v3141_v58  ;;  %v4623_v24 = vpack.c.bf16 %v3265_v50, %v3264_v45  ;;  %v3221_v58 = vld [vmem:[%s6149_s13 + $0x268] sm:$0xff]  ;;  %v4599_v59 = vpack.c.bf16 %v3237_v42, %v3236_v36 }
 0x9aa   :  { %v3125_v17 = vpop.f32.mrb[9].mxu0  ;;  %4580 = vmatprep.subr.bf16.mxu1 %v4579_v48  ;;  %v3267_v48 = vld [vmem:[%s6149_s13 + $0x3d8] sm:$0xff]  ;;  %v4601_v13 = vpack.c.bf16 %v3221_v58, %v3220_v53 }
 0x9ab   :  { %v4646_v56 = vadd.f32 %v3125_v17, %v5927_v16  ;;  %3415 = vmatprep.mubr.f32.mxu0 %v3139_v32  ;;  %v4627_v61 = vpack.c.bf16 %v3267_v48, %v3266_v44  ;;  %v3238_v32 = vld [vmem:[%s6149_s13 + $0x2f0] sm:$0xff] }
 0x9ac   :  { %3416 = vmatmul.mubr.f32.vlgmr.msra.gmra.mrb[20].mxu0 %v3138_v15  ;;  %v4629_v15 = vpack.c.bf16 %v3251_v4, %v3250_v63  ;;  %v3222_v17 = vld [vmem:[%s6149_s13 + $0x270] sm:$0xff] }
 0x9ad   :  { %v3143_v23 = vmax.f32 %v4646_v56, 0.0  ;;  %4582 = vmatpush3.bf16.msra.mxu1 %v4581_v8  ;;  %4610 = vmatpush3.bf16.msra.mxu0 %v4609_v9  ;;  %v3239_v8 = vld [vmem:[%s6149_s13 + $0x2f8] sm:$0xff]  ;;  %v3268_v9 = vld [vmem:[%s6149_s13 + $0x3e0] sm:$0xff]  ;;  %v3270_v56 = vld [vmem:[%s6149_s13 + $0x3f0] sm:$0xff]  ;;  %v4605_v12 = vpack.c.bf16 %v3223_v27, %v3222_v17 }
 0x9ae   :  { %4584 = vmatprep.subr.bf16.mxu1 %v4583_v19  ;;  %4612 = vmatprep.subr.bf16.mxu0 %v4611_v25  ;;  %v4603_v19 = vpack.c.bf16 %v3239_v8, %v3238_v32  ;;  %v4631_v25 = vpack.c.bf16 %v3269_v11, %v3268_v9 }
 0x9af   :  { %3555 = vmatprep.mubr.f32.mxu0 %v3143_v23  ;;  %v4643_v23 = vadd.f32 %v5929_v21, %v5927_v16 }
 0x9b1   :  { %4586 = vmatpush3.bf16.msra.mxu1 %v4585_v26  ;;  %4614 = vmatpush3.bf16.msra.mxu0 %v4613_v30  ;;  %v4635_v26 = vpack.c.bf16 %v3271_v0, %v3270_v56  ;;  %v3254_v30 = vld [vmem:[%s6149_s13 + $0x370] sm:$0xff]  ;;  %s4752_s13 = smov [#allocation4]  }
 0x9b2   :  { %4588 = vmatprep.subr.bf16.mxu1 %v4587_v40  ;;  %4616 = vmatprep.subr.bf16.mxu0 %v4615_v43  ;;  %v4637_v39 = vpack.c.bf16 %v3255_v38, %v3254_v30  ;;  %v3140_v40 = vmax.f32 %v4643_v23, 0.0  ;;  %v4645_v43 = vadd.f32 %v5972_v5, %v5927_v16  ;;  %s3568_s5 = sshll.u32 %s4752_s13, 4  ;;  %s3569_s5 = int_to_ptr.vmem [resolvable:$true] %s3568_s5 }
 0x9b3   :  { %s4722_s9 = scalar_lea.vmem %s3569_s5, 128  ;;  %p4727_p1 = scmp.lt.s32.totalorder %s3569_s5, %s3569_s5 }
 0x9b4   :  { %v3142_v21 = vmax.f32 %v4645_v43, 0.0  ;;  %p4723_p0 = scmp.ne.s32.totalorder %s3569_s5, %s4722_s9  ;;  %p4728_p2 = scmp.lt.s32.totalorder %s4722_s9, %s4722_s9 }
 0x9b5   :  { %4590 = vmatpush3.bf16.msra.mxu1 %v4589_v60  ;;  %4618 = vmatpush3.bf16.msra.mxu0 %v4617_v1 }
 0x9b6   :  { %4592 = vmatprep.subr.bf16.mxu1 %v4591_v10  ;;  %4620 = vmatprep.subr.bf16.mxu0 %v4619_v20  ;;  %p4729_p3 = por %p4728_p2, %p4727_p1 }
 0x9b8   :  { %p4730_p4 = pnand %p4729_p3, %p4723_p0 }
 0x9b9   :  { %4594 = vmatpush3.bf16.msra.mxu1 %v4593_v22  ;;  %4622 = vmatpush3.bf16.msra.mxu0 %v4621_v54 }
 0x9ba   :  { %4596 = vmatprep.subr.bf16.mxu1 %v4595_v18  ;;  %4624 = vmatprep.subr.bf16.mxu0 %v4623_v24 }
 0x9bd   :  { %4598 = vmatpush3.bf16.msra.mxu1 %v4597_v49  ;;  %4626 = vmatpush3.bf16.msra.mxu0 %v4625_v52 }
 0x9be   :  { %4600 = vmatprep.subr.bf16.mxu1 %v4599_v59  ;;  %4628 = vmatprep.subr.bf16.mxu0 %v4627_v61 }
 0x9c1   :  { %4602 = vmatpush3.bf16.msra.mxu1 %v4601_v13  ;;  %4630 = vmatpush3.bf16.msra.mxu0 %v4629_v15 }
 0x9c2   :  { %4604 = vmatprep.subr.bf16.mxu1 %v4603_v19  ;;  %4632 = vmatprep.subr.bf16.mxu0 %v4631_v25 }
 0x9c5   :  { %4606 = vmatpush3.bf16.msra.mxu1 %v4605_v12  ;;  %4634 = vmatpush3.bf16.msra.mxu0 %v4633_v14 }
 0x9c6   :  { %4636 = vmatprep.subr.bf16.mxu0 %v4635_v26 }
 0x9c8   :  { %3486 = vmatmul.mubr.f32.vlgmr.msra.gmra.mrb[38].mxu1 %v3140_v40 }
 0x9c9   :  { %4638 = vmatpush3.bf16.msra.mxu0 %v4637_v39 }
 0x9cc   :  { %3556 = vmatmul.mubr.f32.vlgmr.msra.gmra.mrb[22].mxu0 %v3142_v21 }
 0xa7b   :  { %v4009_v46 = vpop.f32.mrb[36].mxu1 }
 0xa7c   :  { %v4010_v47 = vpop.f32.mrb[37].mxu1 }
 0xa7d   :  { %v4011_v51 = vadd.f32 %v4010_v47, %v4009_v46 }
 0xa7f   :  { %v4044_v55 = vpop.f32.mrb[20].mxu0  ;;  %v3348_v60 = vadd.f32 %v4011_v51, %v3279_v3 }
 0xa80   :  { %v4045_v57 = vpop.f32.mrb[21].mxu0 }
 0xa81   :  { %v4046_v1 = vadd.f32 %v4045_v57, %v4044_v55 }
 0xa83   :  { %v3418_v6 = vadd.f32 %v4046_v1, %v3348_v60 }
 0xa9b   :  { %v4079_v7 = vpop.f32.mrb[38].mxu1 }
 0xa9c   :  { %v4080_v10 = vpop.f32.mrb[39].mxu1 }
 0xa9d   :  { %v4081_v20 = vadd.f32 %v4080_v10, %v4079_v7 }
 0xa9f   :  { %v3488_v28 = vadd.f32 %v4081_v20, %v3418_v6  ;;  %v4114_v33 = vpop.f32.mrb[22].mxu0 }
 0xaa0   :  { %v4115_v16 = vpop.f32.mrb[23].mxu0 }
 0xaa1   :  { %v4116_v5 = vadd.f32 %v4115_v16, %v4114_v33 }
 0xaa3   :  { %v3558_v37 = vadd.f32 %v4116_v5, %v3488_v28 }
 0xaa5   :  { %3561 = vst.msk [vmem:[#allocation4] sm:$0xff] %vm325_vm4, %v3558_v37 }
 0xaa6   :  { %4733 = shalt.err (!%p4730_p4)
}
 0xaa7   :  { %s4734_s18 = scalar_lea.hbm %s6151_s16, 128 }
 0xaa8   :  { %p4735_p5 = scmp.ne.s32.totalorder %s6151_s16, %s4734_s18  ;;  %p4738_p6 = scmp.lt.u32.totalorder %s4734_s18, %s6151_s16 }
 0xaaa   :  { %p4740_p7 = pnand %p4738_p6, %p4735_p5 }
 0xaac   :  { %4743 = shalt.err (!%p4740_p7)
}
 0xaad   :  { %3571 = dma.vmem_to_hbm [thread:$0]  %s3569_s5, 128, %s6151_s16, [#allocation5]  }
 0xaae   :  { %4744 = dma.done.wait [#allocation5], 128  }
 0xaaf   :  { %4745 = vsyncadd [#allocation5], 4294967168 }
 0xab0   :  { %3575 = vsyncpa [#allocation5], 1 }

</bundles_post_ra>
